<compile_context>
chip_gen: v7x
topology: tpu7x:2x2x1
jax: 0.10.0
libtpu: 0.0.40
codegen_flags: <defaults>
</compile_context>

<pallas_src>
import numpy as np
import jax
import jax.numpy as jnp
from jax.experimental import pallas as pl
from jax.experimental.pallas import tpu as pltpu

# ---------------- configuration (mirrors the module __init__) ----------------
SAMPLE_RATE = 16000
WIN_LENGTH = int(np.round(SAMPLE_RATE * 0.025))        # 400
N_FFT = WIN_LENGTH                                     # 400
HOP = int(np.round(SAMPLE_RATE * 0.01))                # 160
N_MELS = 128
F_MIN = 0.0
F_MAX = SAMPLE_RATE // 2                               # 8000
LOG_OFFSET = 0.001
N_FREQS = N_FFT // 2 + 1                               # 201

NFREQ_PAD = 256                                        # >= 201, multiple of 128
N_CHUNKS = 3                                           # ceil(N_FFT / HOP)
DFT_ROWS = N_CHUNKS * HOP                              # 480 (rows 400:480 are zero)
TM_MAX = 1024                                          # max frames per time tile


# ---------------- parameter construction (deterministic, in-script) ----------
def _hz_to_mel_slaney(f):
    f = np.asarray(f, dtype=np.float64)
    f_sp = 200.0 / 3.0
    mels = f / f_sp
    min_log_hz = 1000.0
    min_log_mel = min_log_hz / f_sp
    logstep = np.log(6.4) / 27.0
    return np.where(f >= min_log_hz,
                    min_log_mel + np.log(np.maximum(f, 1e-10) / min_log_hz) / logstep,
                    mels)


def _mel_to_hz_slaney(m):
    m = np.asarray(m, dtype=np.float64)
    f_sp = 200.0 / 3.0
    freqs = m * f_sp
    min_log_hz = 1000.0
    min_log_mel = min_log_hz / f_sp
    logstep = np.log(6.4) / 27.0
    return np.where(m >= min_log_mel,
                    min_log_hz * np.exp(logstep * (m - min_log_mel)),
                    freqs)


def make_mel_fbank():
    """torchaudio.functional.melscale_fbanks(mel_scale='slaney', norm='slaney'),
    zero-padded to (NFREQ_PAD, N_MELS), float32 (mel matmul runs in f32)."""
    all_freqs = np.linspace(0, SAMPLE_RATE // 2, N_FREQS)
    m_min = _hz_to_mel_slaney(F_MIN)
    m_max = _hz_to_mel_slaney(F_MAX)
    m_pts = np.linspace(m_min, m_max, N_MELS + 2)
    f_pts = _mel_to_hz_slaney(m_pts)

    f_diff = f_pts[1:] - f_pts[:-1]                               # (n_mels+1,)
    slopes = f_pts[None, :] - all_freqs[:, None]                  # (n_freqs, n_mels+2)
    down_slopes = (-1.0 * slopes[:, :-2]) / f_diff[:-1]           # (n_freqs, n_mels)
    up_slopes = slopes[:, 2:] / f_diff[1:]                        # (n_freqs, n_mels)
    fb = np.maximum(0.0, np.minimum(down_slopes, up_slopes))

    # slaney area normalization
    enorm = 2.0 / (f_pts[2:N_MELS + 2] - f_pts[:N_MELS])
    fb = fb * enorm[None, :]

    fb_pad = np.zeros((NFREQ_PAD, N_MELS), dtype=np.float32)
    fb_pad[:N_FREQS, :] = fb.astype(np.float32)
    return fb_pad


def make_dft_matrix():
    """Fused one-sided DFT matrix [cos | -sin], periodic-hann window folded into
    the rows. Shape (DFT_ROWS=480, 2*NFREQ_PAD=512); rows 400:480 and padded
    columns are zero so they contribute nothing to the partial matmuls."""
    n = np.arange(N_FFT, dtype=np.float64)
    k = np.arange(N_FREQS, dtype=np.float64)
    ang = 2.0 * np.pi * n[:, None] * k[None, :] / N_FFT
    # periodic hann (torch.hann_window default); win_length == n_fft here.
    win = 0.5 * (1.0 - np.cos(2.0 * np.pi * n / WIN_LENGTH))
    cos_m = np.cos(ang) * win[:, None]
    sin_m = -np.sin(ang) * win[:, None]
    dft = np.zeros((DFT_ROWS, 2 * NFREQ_PAD), dtype=np.float32)
    dft[:N_FFT, :N_FREQS] = cos_m
    dft[:N_FFT, NFREQ_PAD:NFREQ_PAD + N_FREQS] = sin_m
    return dft


def _round_up(x, m):
    return ((x + m - 1) // m) * m


def _cdiv(a, b):
    return (a + b - 1) // b


# ---------------- Pallas kernel ----------------------------------------------
def _logmel_kernel(chunks_ref, halo_ref, dft_ref, fb_ref, out_ref):
    # chunks_ref: (1, TM, HOP)            bf16  hop-chunks [m*TM, m*TM+TM)
    # halo_ref:   (1, 1, 2, HOP)          bf16  hop-chunks m*TM+TM, m*TM+TM+1
    # dft_ref:    (DFT_ROWS, 2*NFREQ_PAD) bf16  [win*cos | -win*sin], zero padded
    # fb_ref:     (NFREQ_PAD, N_MELS)     f32   mel filterbank
    # out_ref:    (1, N_MELS, TM)         f32   (written transposed, lane-dense)
    tm = chunks_ref.shape[1]

    # In-kernel framing: frame t = [chunk t | chunk t+1 | chunk t+2 (first 80)].
    # Build the (TM+2, HOP) extended chunk slab in f32 (cheap, lossless round
    # trip) so the +1 / +2 sublane-offset slices are plain 32-bit relayouts.
    c = chunks_ref[0].astype(jnp.float32)                         # (TM, HOP)
    h = halo_ref[...][0, 0].astype(jnp.float32)                   # (2, HOP)
    c_ext = jnp.concatenate([c, h], axis=0)                       # (TM+2, HOP)

    d = dft_ref[...]                                              # (480, 512) bf16
    # Sum of 3 partial matmuls == windowed one-sided DFT of the 400-sample frame.
    spec = jnp.dot(c_ext[0:tm].astype(jnp.bfloat16), d[0:HOP],
                   preferred_element_type=jnp.float32)
    spec = spec + jnp.dot(c_ext[1:tm + 1].astype(jnp.bfloat16), d[HOP:2 * HOP],
                          preferred_element_type=jnp.float32)
    spec = spec + jnp.dot(c_ext[2:tm + 2].astype(jnp.bfloat16), d[2 * HOP:3 * HOP],
                          preferred_element_type=jnp.float32)     # (TM, 512)

    re = spec[:, :NFREQ_PAD]                                      # lane-aligned split
    im = spec[:, NFREQ_PAD:]
    power = re * re + im * im                                     # |X|^2, f32 (power=2.0)

    # Mel projection kept in f32 for precision (fbank matmul is ~14% of FLOPs).
    mel = jnp.dot(power, fb_ref[...], preferred_element_type=jnp.float32)  # (TM, 128)

    # Transposed, lane-dense store. XLU transpose slot has slack; if it ever
    # becomes binding at large TM, drop the .T and emit time-major instead.
    out_ref[0] = jnp.log(mel + LOG_OFFSET).T                      # (N_MELS, TM)


def log_mel_spectrogram(waveform):
    """waveform: (B, num_samples) float32 -> (B, n_mels, n_frames) float32."""
    waveform = waveform.astype(jnp.float32)
    B, num_samples = waveform.shape
    assert num_samples >= N_FFT, "waveform too short for center=False framing"
    n_frames = (num_samples - N_FFT) // HOP + 1
    assert 2 * HOP < N_FFT <= 3 * HOP      # 3-chunk in-kernel framing relies on this

    # ---- tile-size selection -------------------------------------------------
    T128 = _round_up(n_frames, 128)
    n_t = _cdiv(T128, TM_MAX)                       # aim for <= TM_MAX frames/tile
    if B == 1 and n_t == 1 and T128 >= 256:
        n_t = 2                                     # v7x: >= 2 time tiles -> both TCs busy
    TM = _round_up(_cdiv(T128, n_t), 128)           # multiple of 128 (lane-dense stores)
    T_pad = n_t * TM

    # ---- glue: hop-chunk view + per-tile 2-chunk halos (no frames blow-up) ----
    needed = (T_pad + 2) * HOP
    if needed >= num_samples:
        wav_p = jnp.pad(waveform, ((0, 0), (0, needed - num_samples)))
    else:
        wav_p = waveform[:, :needed]                # extra tail samples never used

    w2d = wav_p[:, :T_pad * HOP].astype(jnp.bfloat16).reshape(B, T_pad, HOP)
    halos = jnp.concatenate(
        [wav_p[:, (m + 1) * TM * HOP:((m + 1) * TM + 2) * HOP]
         .astype(jnp.bfloat16).reshape(B, 1, 2, HOP)
         for m in range(n_t)], axis=1)              # (B, n_t, 2, HOP)  -- tiny

    dft = jnp.asarray(make_dft_matrix(), dtype=jnp.bfloat16)      # (480, 512)
    fb = jnp.asarray(make_mel_fbank(), dtype=jnp.float32)         # (256, 128)

    out = pl.pallas_call(
        _logmel_kernel,
        out_shape=jax.ShapeDtypeStruct((B, N_MELS, T_pad), jnp.float32),
        grid_spec=pltpu.PrefetchScalarGridSpec(
            num_scalar_prefetch=0,
            grid=(B, n_t),
            in_specs=[
                pl.BlockSpec((1, TM, HOP), lambda b, m: (b, m, 0)),
                pl.BlockSpec((1, 1, 2, HOP), lambda b, m: (b, m, 0, 0)),
                pl.BlockSpec((DFT_ROWS, 2 * NFREQ_PAD), lambda b, m: (0, 0)),
                pl.BlockSpec((NFREQ_PAD, N_MELS), lambda b, m: (0, 0)),
            ],
            out_specs=pl.BlockSpec((1, N_MELS, TM), lambda b, m: (b, 0, m)),
        ),
        compiler_params=pltpu.CompilerParams(
            dimension_semantics=("parallel", "parallel")),
    )(w2d, halos, dft, fb)

    # drop padded frames; layout is already (B, n_mels, T)
    return out[:, :, :n_frames]


# ---------------- main --------------------------------------------------------
if __name__ == "__main__":
    key = jax.random.PRNGKey(0)
    B = 2
    n_frames = 8
    num_samples = N_FFT + HOP * (n_frames - 1)                     # 1520
    waveform = jax.random.normal(key, (B, num_samples), dtype=jnp.float32)

    out = log_mel_spectrogram(waveform)
    out = jax.block_until_ready(out)
    assert out.shape == (B, N_MELS, n_frames), out.shape
    assert bool(jnp.all(jnp.isfinite(out)))
    print("KERNEL_OK")
</pallas_src>

<mosaic_0001>
module attributes {stable_mosaic.version = 11 : i64} {
  func.func @_logmel_kernel(%arg0: i32, %arg1: i32, %arg2: memref<1x128x160xbf16, #tpu.memory_space<vmem>>, %arg3: memref<1x1x2x160xbf16, #tpu.memory_space<vmem>>, %arg4: memref<480x512xbf16, #tpu.memory_space<vmem>>, %arg5: memref<256x128xf32, #tpu.memory_space<vmem>>, %arg6: memref<1x128x128xf32, #tpu.memory_space<vmem>>) attributes {dimension_semantics = [#tpu.dimension_semantics<parallel>, #tpu.dimension_semantics<parallel>], iteration_bounds = array<i64: 2, 1>, scalar_prefetch = 0 : i64, scratch_operands = 0 : i64, tpu.core_type = #tpu.core_type<tc>, window_params = [{transform_indices = @transform_0, window_bounds = array<i64: 1, 128, 160>}, {transform_indices = @transform_1, window_bounds = array<i64: 1, 1, 2, 160>}, {pipeline_mode = #tpu.pipeline_mode<synchronous>, transform_indices = @transform_2, window_bounds = array<i64: 480, 512>}, {pipeline_mode = #tpu.pipeline_mode<synchronous>, transform_indices = @transform_3, window_bounds = array<i64: 256, 128>}, {transform_indices = @transform_4, window_bounds = array<i64: 1, 128, 128>}]} {
    %c0 = arith.constant 0 : index
    %c0_0 = arith.constant 0 : index
    %c0_1 = arith.constant 0 : index
    %0 = vector.load %arg2[%c0, %c0_0, %c0_1] : memref<1x128x160xbf16, #tpu.memory_space<vmem>>, vector<1x128x160xbf16>
    %1 = vector.shape_cast %0 : vector<1x128x160xbf16> to vector<128x160xbf16>
    %2 = arith.extf %1 : vector<128x160xbf16> to vector<128x160xf32>
    %c0_2 = arith.constant 0 : index
    %c0_3 = arith.constant 0 : index
    %c0_4 = arith.constant 0 : index
    %c0_5 = arith.constant 0 : index
    %3 = vector.load %arg3[%c0_2, %c0_3, %c0_4, %c0_5] : memref<1x1x2x160xbf16, #tpu.memory_space<vmem>>, vector<1x1x2x160xbf16>
    %4 = vector.shape_cast %3 : vector<1x1x2x160xbf16> to vector<2x160xbf16>
    %5 = arith.extf %4 : vector<2x160xbf16> to vector<2x160xf32>
    %6 = tpu.concatenate %2, %5 in 0 : vector<128x160xf32>, vector<2x160xf32> -> vector<130x160xf32>
    %c0_6 = arith.constant 0 : index
    %c0_7 = arith.constant 0 : index
    %7 = vector.load %arg4[%c0_6, %c0_7] : memref<480x512xbf16, #tpu.memory_space<vmem>>, vector<480x512xbf16>
    %8 = vector.extract_strided_slice %6 {offsets = [0, 0], sizes = [128, 160], strides = [1, 1]} : vector<130x160xf32> to vector<128x160xf32>
    %9 = arith.truncf %8 : vector<128x160xf32> to vector<128x160xbf16>
    %10 = vector.extract_strided_slice %7 {offsets = [0, 0], sizes = [160, 512], strides = [1, 1]} : vector<480x512xbf16> to vector<160x512xbf16>
    %cst = arith.constant dense<0.000000e+00> : vector<128x512xf32>
    %11 = tpu.matmul %9, %10, %cst {dimension_numbers = #tpu.dot_dimension_numbers<[1], [0], [0], [1], [0, 0, 1, 1], [], []>} : vector<128x160xbf16>, vector<160x512xbf16>, vector<128x512xf32> -> vector<128x512xf32>
    %12 = vector.extract_strided_slice %6 {offsets = [1, 0], sizes = [128, 160], strides = [1, 1]} : vector<130x160xf32> to vector<128x160xf32>
    %13 = arith.truncf %12 : vector<128x160xf32> to vector<128x160xbf16>
    %14 = vector.extract_strided_slice %7 {offsets = [160, 0], sizes = [160, 512], strides = [1, 1]} : vector<480x512xbf16> to vector<160x512xbf16>
    %cst_8 = arith.constant dense<0.000000e+00> : vector<128x512xf32>
    %15 = tpu.matmul %13, %14, %cst_8 {dimension_numbers = #tpu.dot_dimension_numbers<[1], [0], [0], [1], [0, 0, 1, 1], [], []>} : vector<128x160xbf16>, vector<160x512xbf16>, vector<128x512xf32> -> vector<128x512xf32>
    %16 = arith.addf %11, %15 : vector<128x512xf32>
    %17 = vector.extract_strided_slice %6 {offsets = [2, 0], sizes = [128, 160], strides = [1, 1]} : vector<130x160xf32> to vector<128x160xf32>
    %18 = arith.truncf %17 : vector<128x160xf32> to vector<128x160xbf16>
    %19 = vector.extract_strided_slice %7 {offsets = [320, 0], sizes = [160, 512], strides = [1, 1]} : vector<480x512xbf16> to vector<160x512xbf16>
    %cst_9 = arith.constant dense<0.000000e+00> : vector<128x512xf32>
    %20 = tpu.matmul %18, %19, %cst_9 {dimension_numbers = #tpu.dot_dimension_numbers<[1], [0], [0], [1], [0, 0, 1, 1], [], []>} : vector<128x160xbf16>, vector<160x512xbf16>, vector<128x512xf32> -> vector<128x512xf32>
    %21 = arith.addf %16, %20 : vector<128x512xf32>
    %22 = vector.extract_strided_slice %21 {offsets = [0, 0], sizes = [128, 256], strides = [1, 1]} : vector<128x512xf32> to vector<128x256xf32>
    %23 = vector.extract_strided_slice %21 {offsets = [0, 256], sizes = [128, 256], strides = [1, 1]} : vector<128x512xf32> to vector<128x256xf32>
    %24 = arith.mulf %22, %22 : vector<128x256xf32>
    %25 = arith.mulf %23, %23 : vector<128x256xf32>
    %26 = arith.addf %24, %25 : vector<128x256xf32>
    %c0_10 = arith.constant 0 : index
    %c0_11 = arith.constant 0 : index
    %27 = vector.load %arg5[%c0_10, %c0_11] : memref<256x128xf32, #tpu.memory_space<vmem>>, vector<256x128xf32>
    %cst_12 = arith.constant dense<0.000000e+00> : vector<128x128xf32>
    %28 = tpu.matmul %26, %27, %cst_12 {dimension_numbers = #tpu.dot_dimension_numbers<[1], [0], [0], [1], [0, 0, 1, 1], [], []>} : vector<128x256xf32>, vector<256x128xf32>, vector<128x128xf32> -> vector<128x128xf32>
    %cst_13 = arith.constant 1.000000e-03 : f32
    %29 = vector.broadcast %cst_13 : f32 to vector<128x128xf32>
    %30 = arith.addf %28, %29 : vector<128x128xf32>
    %31 = math.log %30 : vector<128x128xf32>
    %32 = tpu.transpose %31, [1, 0] : vector<128x128xf32> -> vector<128x128xf32>
    %c0_14 = arith.constant 0 : index
    %c0_15 = arith.constant 0 : index
    %c0_16 = arith.constant 0 : index
    %33 = vector.load %arg6[%c0_14, %c0_15, %c0_16] : memref<1x128x128xf32, #tpu.memory_space<vmem>>, vector<1x128x128xf32>
    %34 = vector.shape_cast %33 : vector<1x128x128xf32> to vector<128x128xf32>
    %35 = vector.shape_cast %32 : vector<128x128xf32> to vector<1x128x128xf32>
    tpu.vector_store %arg6[%c0_14, %c0_15, %c0_16], %35 {strides = array<i32>} : memref<1x128x128xf32, #tpu.memory_space<vmem>>, vector<1x128x128xf32>,
    return
  }
  func.func @transform_0(%arg0: i32, %arg1: i32) -> (i32, i32, i32) {
    %c0_i32 = arith.constant 0 : i32
    %c0_i32_0 = arith.constant 0 : i32
    return %arg0, %arg1, %c0_i32 : i32, i32, i32
  }
  func.func @transform_1(%arg0: i32, %arg1: i32) -> (i32, i32, i32, i32) {
    %c0_i32 = arith.constant 0 : i32
    %c0_i32_0 = arith.constant 0 : i32
    %c0_i32_1 = arith.constant 0 : i32
    return %arg0, %arg1, %c0_i32, %c0_i32_0 : i32, i32, i32, i32
  }
  func.func @transform_2(%arg0: i32, %arg1: i32) -> (i32, i32) {
    %c0_i32 = arith.constant 0 : i32
    %c0_i32_0 = arith.constant 0 : i32
    %c0_i32_1 = arith.constant 0 : i32
    return %c0_i32, %c0_i32_0 : i32, i32
  }
  func.func @transform_3(%arg0: i32, %arg1: i32) -> (i32, i32) {
    %c0_i32 = arith.constant 0 : i32
    %c0_i32_0 = arith.constant 0 : i32
    %c0_i32_1 = arith.constant 0 : i32
    return %c0_i32, %c0_i32_0 : i32, i32
  }
  func.func @transform_4(%arg0: i32, %arg1: i32) -> (i32, i32, i32) {
    %c0_i32 = arith.constant 0 : i32
    %c0_i32_0 = arith.constant 0 : i32
    return %arg0, %c0_i32, %arg1 : i32, i32, i32
  }
}

</mosaic_0001>

<bundles_post_ra>
// kernel: tpu_custom_call.1
= control target key start
LH: loop header
LB: loop body
LE: loop exit
PB: predicated region body
PF: predicated region fallthrough
CT: control target
= control target key end

     0   :  { %9 = vsyncpa [#allocation3], 0  ;;  %s3973_s0 = inlined_call_operand.vmem [shape: bf16[2,128,160], index: 0, kind: input, shape index: {}]   ;;  %s3974_s1 = inlined_call_operand.vmem [shape: bf16[2,1,2,160], index: 1, kind: input, shape index: {}]   ;;  %s3975_s2 = inlined_call_operand.hbm [shape: bf16[480,512], index: 2, kind: input, shape index: {}]   ;;  %s3976_s3 = inlined_call_operand.vmem [shape: f32[256,128], index: 3, kind: input, shape index: {}]   ;;  %s3977_s4 = inlined_call_operand.hbm [shape: f32[2,128,128], index: 4, kind: output, shape index: {}]  }
   0x1   :  { %10 = vsyncpa [#allocation4], 0 }
   0x2   :  { %12 = vsyncpa [#allocation4 + $0x1], 0  ;;  %s3476_s15 = smov 0   ;;  %s3478_s16 = smov 0  }
   0x3   :  { %s3480_s17 = smov 0   ;;  %s3482_s18 = smov 0  }
   0x4   :  { %s3484_s19 = smov 0   ;;  %s3486_s20 = smov 0  }
   0x5 LB: > { %s2567_s21 = sadd.s32 4294967295, %s3442_s20   ;;  %s2568_s22 = sadd.s32 4294967294, %s3442_s20   ;;  %s3442_s20 = sphi %s3486_s20, %s18_s20   ;;  %s3438_s19 = sphi %s3484_s19, %s3995_s19   ;;  %s3434_s18 = sphi %s3482_s18, %s3994_s18   ;;  %s3430_s17 = sphi %s3480_s17, %s3993_s17   ;;  %s3426_s16 = sphi %s3478_s16, %s3992_s16   ;;  %s3422_s15 = sphi %s3476_s15, %s3991_s15  }
   0x6   : > { %s30_s23 = sadd.s32 1, %s3438_s19  ;;  %s137_s24 = sadd.s32 1, %s3430_s17 }
   0x7   : > { %p32_p0 = scmp.ge.s32.totalorder %s30_s23, 2  ;;  %p147_p1 = scmp.ne.s32.totalorder %s3430_s17, %s3426_s16 }
   0x8   : > { %p148_p2 = scmp.eq.s32.totalorder %s2567_s21, 1  ;;  %p153_p3 = scmp.ne.s32.totalorder %s3426_s16, %s3422_s15 }
   0x9   : > { %s3997_s23 = smov (%p32_p0, %s30_s23), 0  ;;  %p154_p5 = scmp.eq.s32.totalorder %s2568_s22, 1 }
   0xa   : > { %p3516_p4 = por %p148_p2, %p147_p1  ;;  %s132_s26 = ssub.s32 %s3438_s19, %s3997_s23 }
   0xb   : > { %p2569_p6 = scmp.ge.s32.totalorder %s3442_s20, 1  ;;  %p135_p7 = scmp.eq.s32.totalorder %s132_s26, 0 }
   0xc   : > { %s3982_s25 = scalar_select %p3516_p4, 1, 0 }
   0xd   : > { %p3523_p8 = por %p154_p5, %p153_p3  ;;  %p161_p9 = scmp.lt.s32.totalorder %s3442_s20, 3 }
   0xe   : > { %s3529_s28 = scalar_select %p135_p7, %s3430_s17, %s137_s24  }
   0xf   : > { %s3983_s27 = scalar_select %p3523_p8, 1, 0 }
  0x10   : > { %p3531_p10 = pnand %p2569_p6, %p161_p9  ;;  %p3535_p11 = scmp.eq.s32.totalorder %s2567_s21, 0 }
  0x11   : > { %s3444_s5 = smov [#allocation2]   ;;  %s3332_s10 = scalar_lea.hbm %s3975_s2, 15360 }
  0x12   : > { %s3984_s29 = scalar_select %p3531_p10, 1, 0 }
  0x13   : > { %s3985_s30 = scalar_select %p3535_p11, 1, 0 }
  0x14   : > { %p3031_p12 = pneg %p3531_p10  ;;  %s173_s6 = sshll.u32 %s3444_s5, 4  ;;  %s174_s6 = int_to_ptr.vmem [resolvable:$true] %s173_s6 }
  0x15   : > { %p3333_p0 = scmp.ne.s32.totalorder %s3975_s2, %s3332_s10  ;;  %p3339_p5 = scmp.lt.u32.totalorder %s3332_s10, %s3975_s2 }
  0x16   : > { %p3543_p13 = pnand %p3535_p11, %p3031_p12 }
  0x18   : > { %p3334_p1 = pneg %p3543_p13 }
  0x1a   : > { %p3335_p2 = pnand %p3334_p1, %p3333_p0 }
  0x1c   : > { %p3336_p3 = pneg %p3335_p2 }
  0x1e   : > { %p3341_p6 = pnand %p3339_p5, %p3336_p3 }
  0x20   : > { %3344 = shalt.err (!%p3341_p6)
}
  0x21   : > { %s3345_s21 = scalar_lea.vmem %s174_s6, 15360  ;;  %p3353_p8 = scmp.lt.s32.totalorder %s174_s6, %s174_s6 }
  0x22   : > { %p3346_p7 = scmp.ne.s32.totalorder %s174_s6, %s3345_s21  ;;  %p3354_p4 = scmp.lt.s32.totalorder %s3345_s21, %s3345_s21 }
  0x24   : > { %p3348_p9 = pnand %p3346_p7, %p3334_p1  ;;  %p3355_p11 = por %p3354_p4, %p3353_p8 }
  0x26   : > { %p3349_p12 = pneg %p3348_p9 }
  0x28   : > { %p3356_p10 = pnand %p3355_p11, %p3349_p12 }
  0x2a   : > { %3359 = shalt.err (!%p3356_p10)
}
  0x2b   : > { %s3445_s22 = smov 256   ;;  %s3446_s24 = smov 16  }
  0x2c   : > { %3034 = dma.hbm_to_vmem [thread:$0]  (!%p3543_p13), %s3975_s2, 15360, %s174_s6, [#allocation3], %s3445_s22, %s3445_s22, %s3446_s24  }
  0x2d   : > { %p3987_p0 = scmp.ne.s32.totalorder %s3984_s29, 0 }
  0x2e   : > { %p3988_p2 = scmp.ne.s32.totalorder (!%p3987_p0), %s3985_s30, 0 }
  0x2f   : > { %217 = sbr.rel (%p3987_p0) target bundleno = 876 (0x36c), region = 36 }
  0x36   : > { %3413 = dma.done.wait (%p3988_p2), [#allocation3], 15360  }
  0x37   : > { %3415 = vsyncadd (%p3988_p2), [#allocation3], 4294951936  ;;  %v3096_v0 = vld [vmem:[#allocation2 + $0x144] ss:$16 sps:$4 sm:$0xff]   ;;  %v3098_v1 = vld [vmem:[#allocation2 + $0x14c] ss:$16 sps:$4 sm:$0xff]  }
  0x38   : > { %845 = vmatprep.subr.bf16.mxu0 %v3096_v0  ;;  %v3100_v2 = vld [vmem:[#allocation2 + $0x140] ss:$16 sps:$4 sm:$0xff]   ;;  %v3101_v3 = vld [vmem:[#allocation2 + $0x148] ss:$16 sps:$4 sm:$0xff]   ;;  %958 = vmatprep.subr.bf16.mxu1 %v3098_v1  ;;  %v3102_v4 = vld [vmem:[#allocation2 + $0x164] ss:$16 sps:$4 sm:$0xff]  }
  0x39   : > { %846 = vmatpush1.bf16.msra.mxu0 %v3100_v2  ;;  %959 = vmatpush1.bf16.msra.mxu1 %v3101_v3  ;;  %v3104_v5 = vld [vmem:[#allocation2 + $0x16c] ss:$16 sps:$4 sm:$0xff]   ;;  %v3106_v6 = vld [vmem:[#allocation2 + $0x160] ss:$16 sps:$4 sm:$0xff]   ;;  %v3107_v7 = vld [vmem:[#allocation2 + $0x168] ss:$16 sps:$4 sm:$0xff]  }
  0x3a   : > { %847 = vmatprep.subr.bf16.mxu0 %v3102_v4  ;;  %960 = vmatprep.subr.bf16.mxu1 %v3104_v5  ;;  %v3108_v8 = vld [vmem:[#allocation2 + $0x184] ss:$16 sps:$4 sm:$0xff]   ;;  %v3110_v9 = vld [vmem:[#allocation2 + $0x18c] ss:$16 sps:$4 sm:$0xff]   ;;  %v3112_v10 = vld [vmem:[#allocation2 + $0x180] ss:$16 sps:$4 sm:$0xff]  }
  0x3b   : > { %v3113_v11 = vld [vmem:[#allocation2 + $0x188] ss:$16 sps:$4 sm:$0xff]   ;;  %v3114_v12 = vld [vmem:[#allocation2 + $0x1a4] ss:$16 sps:$4 sm:$0xff]   ;;  %v3116_v13 = vld [vmem:[#allocation2 + $0x1ac] ss:$16 sps:$4 sm:$0xff]  }
  0x3c   : > { %v3118_v14 = vld [vmem:[#allocation2 + $0x1a0] ss:$16 sps:$4 sm:$0xff]   ;;  %v3119_v15 = vld [vmem:[#allocation2 + $0x1a8] ss:$16 sps:$4 sm:$0xff]   ;;  %v3120_v16 = vld [vmem:[#allocation2 + $0x1c4] ss:$16 sps:$4 sm:$0xff]  }
  0x3d   : > { %848 = vmatpush1.bf16.msra.mxu0 %v3106_v6  ;;  %961 = vmatpush1.bf16.msra.mxu1 %v3107_v7  ;;  %v3122_v17 = vld [vmem:[#allocation2 + $0x1cc] ss:$16 sps:$4 sm:$0xff]   ;;  %p257_p4 = scmp.lt.s32.totalorder %s3434_s18, 1  ;;  %v3124_v18 = vld [vmem:[#allocation2 + $0x1c0] ss:$16 sps:$4 sm:$0xff]   ;;  %vm820_vm1 = vcmask 261120  }
  0x3e   : > { %849 = vmatprep.subr.bf16.mxu0 %v3108_v8  ;;  %962 = vmatprep.subr.bf16.mxu1 %v3110_v9  ;;  %v3125_v19 = vld [vmem:[#allocation2 + $0x1c8] ss:$16 sps:$4 sm:$0xff]   ;;  %v3126_v20 = vld [vmem:[#allocation2 + $0x1e4] ss:$16 sps:$4 sm:$0xff]   ;;  %v3128_v21 = vld [vmem:[#allocation2 + $0x1ec] ss:$16 sps:$4 sm:$0xff]  }
  0x3f   : > { %s3571_s29 = scalar_select %p257_p4, %s3434_s18, 1  ;;  %v3130_v22 = vld [vmem:[#allocation2 + $0x1e0] ss:$16 sps:$4 sm:$0xff]   ;;  %v3131_v23 = vld [vmem:[#allocation2 + $0x1e8] ss:$16 sps:$4 sm:$0xff]   ;;  %vm1531_vm2 = vcmask 1046528  }
  0x40   : > { %v3132_v24 = vld [vmem:[#allocation2 + $0x204] ss:$16 sps:$4 sm:$0xff]   ;;  %v3134_v25 = vld [vmem:[#allocation2 + $0x20c] ss:$16 sps:$4 sm:$0xff]   ;;  %v3136_v26 = vld [vmem:[#allocation2 + $0x200] ss:$16 sps:$4 sm:$0xff]  }
  0x41   : > { %850 = vmatpush1.bf16.msra.mxu0 %v3112_v10  ;;  %963 = vmatpush1.bf16.msra.mxu1 %v3113_v11  ;;  %s2767_s30 = sshll.u32 %s3571_s29, 7  ;;  %v3137_v27 = vld [vmem:[#allocation2 + $0x208] ss:$16 sps:$4 sm:$0xff]   ;;  %v3138_v28 = vld [vmem:[#allocation2 + $0x224] ss:$16 sps:$4 sm:$0xff]   ;;  %s2577_s9 = sshll.u32 %s3571_s29, 1 }
  0x42   : > { %851 = vmatprep.subr.bf16.mxu0 %v3114_v12  ;;  %964 = vmatprep.subr.bf16.mxu1 %v3116_v13  ;;  %v3140_v29 = vld [vmem:[#allocation2 + $0x22c] ss:$16 sps:$4 sm:$0xff]   ;;  %s3577_s8 = scalar_lea.vmem %s3973_s0, %s2767_s30  ;;  %v3142_v30 = vld [vmem:[#allocation2 + $0x220] ss:$16 sps:$4 sm:$0xff]   ;;  %v3143_v31 = vld [vmem:[#allocation2 + $0x228] ss:$16 sps:$4 sm:$0xff]   ;;  %s274_s12 = scalar_lea.vmem %s3974_s1, %s2577_s9 }
  0x43   : > { %v3144_v32 = vld [vmem:[#allocation2 + $0x244] ss:$16 sps:$4 sm:$0xff]   ;;  %v3146_v33 = vld [vmem:[#allocation2 + $0x24c] ss:$16 sps:$4 sm:$0xff]   ;;  %v3586_v36 = vld [vmem:[%s3577_s8] ss:$8 sps:$4 sm:$0xff]  }
  0x44   : > { %v3580_v34 = vld [vmem:[%s3577_s8 + $0x4] ss:$8 sps:$4 sm:$0xff]   ;;  %v3583_v35 = vld [vmem:[%s3577_s8 + $0x14] ss:$8 sps:$4 sm:$0xff]   ;;  %vm475_vm0 = vsmask.f32 7424 }
  0x45   : > { %852 = vmatpush1.bf16.msra.mxu0 %v3118_v14  ;;  %965 = vmatpush1.bf16.msra.mxu1 %v3119_v15  ;;  %v3589_v37 = vld [vmem:[%s3577_s8 + $0x10] ss:$8 sps:$4 sm:$0xff]   ;;  %v489_v39 = vshrl.u32 %v3580_v34, 16  ;;  %v491_v40 = vshll.u32 %v3580_v34, 16  ;;  %v496_v41 = vshll.u32 %v3583_v35, 16  ;;  %v479_v44 = vshll.u32 %v3586_v36, 16 }
  0x46   : > { %853 = vmatprep.subr.bf16.mxu0 %v3120_v16  ;;  %966 = vmatprep.subr.bf16.mxu1 %v3122_v17  ;;  %v3148_v38 = vld [vmem:[#allocation2 + $0x240] ss:$16 sps:$4 sm:$0xff]   ;;  %v3149_v42 = vld [vmem:[#allocation2 + $0x248] ss:$16 sps:$4 sm:$0xff]   ;;  %v3150_v43 = vld [vmem:[#allocation2 + $0x264] ss:$16 sps:$4 sm:$0xff]  }
  0x47   : > { %v493_v45 = vrot.slane %v491_v40, 1  ;;  %v498_v46 = vrot.slane %v496_v41, 1  ;;  %v477_v47 = vshrl.u32 %v3586_v36, 16  ;;  %v484_v48 = vshll.u32 %v3589_v37, 16  ;;  %v3152_v49 = vld [vmem:[#allocation2 + $0x26c] ss:$16 sps:$4 sm:$0xff]  }
  0x48   : > { %v481_v50 = vrot.slane %v479_v44, 1  ;;  %v3154_v51 = vld [vmem:[#allocation2 + $0x260] ss:$16 sps:$4 sm:$0xff]   ;;  %v508_v53 = vshrl.u32 %v3583_v35, 16  ;;  %v3599_v54 = vld [vmem:[%s3577_s8 + $0x24] ss:$8 sps:$4 sm:$0xff]  }
  0x49   : > { %854 = vmatpush1.bf16.msra.mxu0 %v3124_v18  ;;  %967 = vmatpush1.bf16.msra.mxu1 %v3125_v19  ;;  %v494_v52 = vor.u32 %v493_v45, %v489_v39  ;;  %v3155_v55 = vld [vmem:[#allocation2 + $0x268] ss:$16 sps:$4 sm:$0xff]   ;;  %v486_v58 = vrot.slane %v484_v48, 1  ;;  %v3164_v59 = vld [vmem:[#allocation2 + $0x4] ss:$16 sps:$4 sm:$0xff]   ;;  %v512_v60 = vshll.u32 %v3599_v54, 16 }
  0x4a   : > { %855 = vmatprep.subr.bf16.mxu0 %v3126_v20  ;;  %968 = vmatprep.subr.bf16.mxu1 %v3128_v21  ;;  %v482_v57 = vor.u32 %v481_v50, %v477_v47  ;;  %v3167_v61 = vld [vmem:[#allocation2 + $0xc] ss:$16 sps:$4 sm:$0xff]   ;;  %v3604_v62 = vld [vmem:[%s3577_s8 + $0x20] ss:$8 sps:$4 sm:$0xff]   ;;  %v510_v63 = vor.u32 %v508_v53, %v498_v46  ;;  %v500_v4 = vshrl.u32 %v3589_v37, 16  ;;  %v524_v11 = vshrl.u32 %v3599_v54, 16 }
  0x4b   : > { %v499_v56 = vsel %vm475_vm0, %v494_v52, %v498_v46  ;;  %v514_v0 = vrot.slane %v512_v60, 1  ;;  %v3162_v1 = vld [vmem:[#allocation2] ss:$16 sps:$4 sm:$0xff]   ;;  %v3165_v2 = vld [vmem:[#allocation2 + $0x8] ss:$16 sps:$4 sm:$0xff]   ;;  %v504_v5 = vshll.u32 %v3604_v62, 16  ;;  %v330_v50 = vlaneseq }
  0x4c   : > { %2634 = vmatprep.mubr.msk.bf16.mxu0 %vm820_vm1, %v499_v56  ;;  %2642 = vmatprep.mubr.msk.bf16.mxu1 %vm820_vm1, %v499_v56  ;;  %v487_v3 = vsel %vm475_vm0, %v482_v57, %v486_v58  ;;  %v3612_v6 = vld [vmem:[%s3577_s8 + $0x34] ss:$8 sps:$4 sm:$0xff]   ;;  %v3170_v9 = vld [vmem:[#allocation2 + $0x20] ss:$16 sps:$4 sm:$0xff]   ;;  %v3173_v13 = vld [vmem:[#allocation2 + $0x28] ss:$16 sps:$4 sm:$0xff]   ;;  %v502_v15 = vor.u32 %v500_v4, %v486_v58 }
  0x4d   : > { %856 = vmatpush1.bf16.msra.mxu0 %v3130_v22  ;;  %969 = vmatpush1.bf16.msra.mxu1 %v3131_v23  ;;  %v3172_v7 = vld [vmem:[#allocation2 + $0x24] ss:$16 sps:$4 sm:$0xff]   ;;  %v515_v8 = vsel %vm475_vm0, %v510_v63, %v514_v0  ;;  %v3175_v10 = vld [vmem:[#allocation2 + $0x2c] ss:$16 sps:$4 sm:$0xff]   ;;  %v528_v12 = vshll.u32 %v3612_v6, 16  ;;  %v506_v16 = vrot.slane %v504_v5, 1  ;;  %v526_v20 = vor.u32 %v524_v11, %v514_v0 }
  0x4e   : > { %857 = vmatprep.subr.bf16.mxu0 %v3132_v24  ;;  %970 = vmatprep.subr.bf16.mxu1 %v3134_v25  ;;  %v3179_v14 = vld [vmem:[#allocation2 + $0x44] ss:$16 sps:$4 sm:$0xff]   ;;  %v3182_v17 = vld [vmem:[#allocation2 + $0x4c] ss:$16 sps:$4 sm:$0xff]   ;;  %v3618_v18 = vld [vmem:[%s3577_s8 + $0x30] ss:$8 sps:$4 sm:$0xff]  }
  0x4f   : > { %v3623_v19 = vld [vmem:[%s3577_s8 + $0x44] ss:$8 sps:$4 sm:$0xff]   ;;  %v530_v21 = vrot.slane %v528_v12, 1  ;;  %v3177_v22 = vld [vmem:[#allocation2 + $0x40] ss:$16 sps:$4 sm:$0xff]   ;;  %v507_v23 = vsel %vm475_vm0, %v502_v15, %v506_v16  ;;  %v516_v25 = vshrl.u32 %v3604_v62, 16 }
  0x50   : > { %v3180_v24 = vld [vmem:[#allocation2 + $0x48] ss:$16 sps:$4 sm:$0xff]   ;;  %v3197_v39 = vld [vmem:[#allocation2 + $0x84] ss:$16 sps:$4 sm:$0xff]   ;;  %v532_v47 = vshrl.u32 %v3618_v18, 16  ;;  %v556_v53 = vshrl.u32 %v3623_v19, 16 }
  0x51   : > { %858 = vmatpush1.bf16.msra.mxu0 %v3136_v26  ;;  %971 = vmatpush1.bf16.msra.mxu1 %v3137_v27  ;;  %v520_v26 = vshll.u32 %v3618_v18, 16  ;;  %v3188_v27 = vld [vmem:[#allocation2 + $0x64] ss:$16 sps:$4 sm:$0xff]   ;;  %v518_v40 = vor.u32 %v516_v25, %v506_v16  ;;  %v3198_v52 = vld [vmem:[#allocation2 + $0x88] ss:$16 sps:$4 sm:$0xff]   ;;  %s253_s13 = sand.u32 1, %s3426_s16  }
  0x52   : > { %859 = vmatprep.subr.bf16.mxu0 %v3138_v28  ;;  %972 = vmatprep.subr.bf16.mxu1 %v3140_v29  ;;  %v540_v28 = vshrl.u32 %v3612_v6, 16  ;;  %v544_v29 = vshll.u32 %v3623_v19, 16  ;;  %v3637_v45 = vld [vmem:[%s3577_s8 + $0x54] ss:$8 sps:$4 sm:$0xff]   ;;  %v3447_v56 = vmov 1983009808  }
  0x53   : > { %v522_v41 = vrot.slane %v520_v26, 1  ;;  %v328_v57 = vunpack.c.l.s4 %v3447_v56  ;;  %v3206_v58 = vld [vmem:[#allocation2 + $0xa4] ss:$16 sps:$4 sm:$0xff]   ;;  %v3647_v60 = vld [vmem:[%s3577_s8 + $0x50] ss:$8 sps:$4 sm:$0xff]   ;;  %s2574_s14 = sshll.u32 %s253_s13, 7 }
  0x54   : > { %v546_v44 = vrot.slane %v544_v29, 1  ;;  %v3655_v4 = vld [vmem:[%s3577_s8 + $0x64] ss:$8 sps:$4 sm:$0xff]   ;;  %v3664_v25 = vld [vmem:[%s3577_s8 + $0x60] ss:$8 sps:$4 sm:$0xff]   ;;  %s3898_s21 = scalar_lea.vmem [#allocation5], %s2574_s14 }
  0x55   : > { %860 = vmatpush1.bf16.msra.mxu0 %v3142_v30  ;;  %973 = vmatpush1.bf16.msra.mxu1 %v3143_v31  ;;  %v531_v30 = vsel %vm475_vm0, %v526_v20, %v530_v21  ;;  %v3186_v31 = vld [vmem:[#allocation2 + $0x60] ss:$16 sps:$4 sm:$0xff]   ;;  %v523_v46 = vsel %vm475_vm0, %v518_v40, %v522_v41  ;;  %v534_v63 = vor.u32 %v532_v47, %v522_v41  ;;  %v329_v5 = vunpack.c.0.s8 %v328_v57  ;;  %v3215_v20 = vld [vmem:[#allocation2 + $0xc8] ss:$16 sps:$4 sm:$0xff]   ;;  %v3233_v40 = vld [vmem:[#allocation2 + $0x10c] ss:$16 sps:$4 sm:$0xff]  }
  0x56   : > { %861 = vmatprep.subr.bf16.mxu0 %v3144_v32  ;;  %974 = vmatprep.subr.bf16.mxu1 %v3146_v33  ;;  %v3189_v32 = vld [vmem:[#allocation2 + $0x68] ss:$16 sps:$4 sm:$0xff]   ;;  %v3191_v33 = vld [vmem:[#allocation2 + $0x6c] ss:$16 sps:$4 sm:$0xff]   ;;  %v576_v16 = vshll.u32 %v3655_v4, 16  ;;  %s2768_s22 = sshll.u32 %s3434_s18, 11 }
  0x57   : > { %v3680_v56 = vld [vmem:[%s3577_s8 + $0x70] ss:$8 sps:$4 sm:$0xff]   ;;  %s2456_s24 = sshll.u32 %s3898_s21, 4  ;;  %s3920_s29 = scalar_lea.hbm %s3977_s4, %s2768_s22  ;;  %s3922_s24 = int_to_ptr.vmem [resolvable:$true] %s2456_s24 }
  0x58   : > { %s3927_s30 = scalar_lea.sflag [#allocation4], %s253_s13  ;;  %s3360_s6 = scalar_lea.vmem %s3922_s24, 2048 }
  0x59   : > { %862 = vmatpush1.bf16.msra.mxu0 %v3148_v38  ;;  %975 = vmatpush1.bf16.msra.mxu1 %v3149_v42  ;;  %v3632_v38 = vld [vmem:[%s3577_s8 + $0x40] ss:$8 sps:$4 sm:$0xff]   ;;  %v3200_v42 = vld [vmem:[#allocation2 + $0x8c] ss:$16 sps:$4 sm:$0xff]   ;;  %p3361_p8 = scmp.ne.s32.totalorder %s3922_s24, %s3360_s6  ;;  %p3989_p10 = scmp.ne.s32.totalorder %s3982_s25, 0 }
  0x5a   : > { %863 = vmatprep.subr.bf16.mxu0 %v3150_v43  ;;  %976 = vmatprep.subr.bf16.mxu1 %v3152_v49  ;;  %v542_v43 = vor.u32 %v540_v28, %v530_v21  ;;  %v536_v48 = vshll.u32 %v3632_v38, 16  ;;  %v3195_v49 = vld [vmem:[#allocation2 + $0x80] ss:$16 sps:$4 sm:$0xff]   ;;  %v548_v12 = vshrl.u32 %v3632_v38, 16  ;;  %s3448_s18 = smov [#allocation5]  }
  0x5b   : > { %v3219_v28 = vld [vmem:[#allocation2 + $0xe0] ss:$16 sps:$4 sm:$0xff]   ;;  %p3362_p11 = pnand %p3361_p8, %p3989_p10  ;;  %s3364_s7 = sshll.u32 %s3448_s18, 4  ;;  %s3365_s7 = int_to_ptr.vmem [resolvable:$false] %s3364_s7 }
  0x5c   : > { %v538_v0 = vrot.slane %v536_v48, 1  ;;  %v3228_v48 = vld [vmem:[#allocation2 + $0x100] ss:$16 sps:$4 sm:$0xff]   ;;  %p3367_p1 = scmp.lt.s32.totalorder %s3922_s24, %s3365_s7 }
  0x5d   : > { %864 = vmatpush1.bf16.msra.mxu0 %v3154_v51  ;;  %977 = vmatpush1.bf16.msra.mxu1 %v3155_v55  ;;  %v547_v51 = vsel %vm475_vm0, %v542_v43, %v546_v44  ;;  %v560_v55 = vshll.u32 %v3637_v45, 16  ;;  %v568_v43 = vshll.u32 %v3664_v25, 16  ;;  %p3363_p13 = pneg %p3362_p11 }
  0x5e   : > { %1287 = vmatprep.subr.bf16.mxu0 %v3164_v59  ;;  %1400 = vmatprep.subr.bf16.mxu1 %v3167_v61  ;;  %v3209_v59 = vld [vmem:[#allocation2 + $0xac] ss:$16 sps:$4 sm:$0xff]   ;;  %v3204_v61 = vld [vmem:[#allocation2 + $0xa0] ss:$16 sps:$4 sm:$0xff]   ;;  %v539_v11 = vsel %vm475_vm0, %v534_v63, %v538_v0  ;;  %v550_v26 = vor.u32 %v548_v12, %v538_v0  ;;  %v3237_v63 = vld [vmem:[#allocation2 + $0x128] ss:$16 sps:$4 sm:$0xff]  }
  0x5f   : > { %v3242_v0 = vld [vmem:[#allocation2 + $0x284] ss:$16 sps:$4 sm:$0xff]  }
  0x60   : > { %878 = vmatmul.mubr.bf16.vlgmr.msra.gmra.mrb[0].mxu0 %v487_v3  ;;  %991 = vmatmul.mubr.bf16.vlgmr.msra.gmra.mrb[0].mxu1 %v487_v3  ;;  %v562_v3 = vrot.slane %v560_v55, 1  ;;  %v570_v55 = vrot.slane %v568_v43, 1  ;;  %v3258_v43 = vld [vmem:[#allocation2 + $0x2e0] ss:$16 sps:$4 sm:$0xff]  }
  0x61   : > { %1288 = vmatpush1.bf16.msra.mxu0 %v3162_v1  ;;  %1401 = vmatpush1.bf16.msra.mxu1 %v3165_v2  ;;  %v3207_v1 = vld [vmem:[#allocation2 + $0xa8] ss:$16 sps:$4 sm:$0xff]   ;;  %v558_v2 = vor.u32 %v556_v53, %v546_v44  ;;  %v588_v44 = vshrl.u32 %v3655_v4, 16 }
  0x62   : > { %2635 = vmatprep.mubr.msk.bf16.mxu0 %vm820_vm1, %v515_v8  ;;  %2643 = vmatprep.mubr.msk.bf16.mxu1 %vm820_vm1, %v515_v8  ;;  %v3214_v8 = vld [vmem:[#allocation2 + $0xc4] ss:$16 sps:$4 sm:$0xff]  }
  0x63   : > { %1289 = vmatprep.subr.bf16.mxu0 %v3172_v7  ;;  %1402 = vmatprep.subr.bf16.mxu1 %v3175_v10  ;;  %v331_v7 = vshrl.u32 %v330_v50, 7  ;;  %v324_v10 = vld [vmem:[%s274_s12] sm:$0x3]  ;;  %v563_v15 = vsel %vm475_vm0, %v558_v2, %v562_v3 }
  0x64   : > { %v325_v21 = vunpack.c.l.bf16 %v324_v10 }
  0x65   : > { %1290 = vmatpush1.bf16.msra.mxu0 %v3170_v9  ;;  %1403 = vmatpush1.bf16.msra.mxu1 %v3173_v13  ;;  %v3217_v9 = vld [vmem:[#allocation2 + $0xcc] ss:$16 sps:$4 sm:$0xff]   ;;  %v552_v13 = vshll.u32 %v3647_v60, 16 }
  0x66   : > { %1291 = vmatprep.subr.bf16.mxu0 %v3179_v14  ;;  %1404 = vmatprep.subr.bf16.mxu1 %v3182_v17  ;;  %v572_v14 = vshrl.u32 %v3637_v45, 16  ;;  %v3212_v17 = vld [vmem:[#allocation2 + $0xc0] ss:$16 sps:$4 sm:$0xff]  }
  0x68   : > { %888 = vmatmul.mubr.bf16.gmra.mrb[4].mxu0 %v507_v23  ;;  %1001 = vmatmul.mubr.bf16.gmra.mrb[4].mxu1 %v507_v23  ;;  %v3221_v23 = vld [vmem:[#allocation2 + $0xe4] ss:$16 sps:$4 sm:$0xff]   ;;  %v574_v29 = vor.u32 %v572_v14, %v562_v3  ;;  %v580_v3 = vshrl.u32 %v3664_v25, 16 }
  0x69   : > { %1292 = vmatpush1.bf16.msra.mxu0 %v3177_v22  ;;  %1405 = vmatpush1.bf16.msra.mxu1 %v3180_v24  ;;  %v332_v22 = vsub.s32 %v329_v5, %v331_v7  ;;  %v3224_v24 = vld [vmem:[#allocation2 + $0xec] ss:$16 sps:$4 sm:$0xff]   ;;  %v584_v5 = vshll.u32 %v3680_v56, 16 }
  0x6a   : > { %2636 = vmatprep.mubr.msk.bf16.mxu0 %vm820_vm1, %v531_v30  ;;  %2644 = vmatprep.mubr.msk.bf16.mxu1 %vm820_vm1, %v531_v30  ;;  %v578_v30 = vrot.slane %v576_v16, 1  ;;  %v582_v10 = vor.u32 %v580_v3, %v570_v55  ;;  %v596_v16 = vshrl.u32 %v3680_v56, 16  ;;  %v3290_v3 = vld [vmem:[#allocation2 + $0x384] ss:$16 sps:$4 sm:$0xff]  }
  0x6b   : > { %1293 = vmatprep.subr.bf16.mxu0 %v3188_v27  ;;  %1406 = vmatprep.subr.bf16.mxu1 %v3191_v33  ;;  %v554_v27 = vrot.slane %v552_v13, 1  ;;  %v333_v33 = vrot.slane %v325_v21, %v332_v22 }
  0x6c   : > { %v590_v57 = vor.u32 %v588_v44, %v578_v30  ;;  %v3261_v44 = vld [vmem:[#allocation2 + $0x2e8] ss:$16 sps:$4 sm:$0xff]  }
  0x6d   : > { %1294 = vmatpush1.bf16.msra.mxu0 %v3186_v31  ;;  %1407 = vmatpush1.bf16.msra.mxu1 %v3189_v32  ;;  %v3222_v31 = vld [vmem:[#allocation2 + $0xe8] ss:$16 sps:$4 sm:$0xff]   ;;  %v3669_v32 = vld [vmem:[%s3577_s8 + $0x74] ss:$8 sps:$4 sm:$0xff]   ;;  %v555_v41 = vsel %vm475_vm0, %v550_v26, %v554_v27  ;;  %v334_v50 = vcombine.high %v333_v33, %v333_v33  ;;  %v3692_v12 = vpack.c.bf16 %v333_v33, %v333_v33  ;;  %s3366_s8 = scalar_lea.vmem %s3365_s7, 4096 }
  0x6e   : > { %1295 = vmatprep.subr.bf16.mxu0 %v3197_v39  ;;  %1408 = vmatprep.subr.bf16.mxu1 %v3200_v42  ;;  %v3230_v39 = vld [vmem:[#allocation2 + $0x104] ss:$16 sps:$4 sm:$0xff]   ;;  %v564_v42 = vshrl.u32 %v3647_v60, 16  ;;  %v592_v47 = vshll.u32 %v3669_v32, 16  ;;  %v3243_v26 = vld [vmem:[#allocation2 + $0x288] ss:$16 sps:$4 sm:$0xff]   ;;  %p3368_p3 = scmp.lt.s32.totalorder %s3366_s8, %s3360_s6 }
  0x6f   : > { %v3257_v33 = vld [vmem:[#allocation2 + $0x2cc] ss:$16 sps:$4 sm:$0xff]  }
  0x70   : > { %898 = vmatmul.mubr.bf16.gmra.mrb[8].mxu0 %v523_v46  ;;  %1011 = vmatmul.mubr.bf16.gmra.mrb[8].mxu1 %v523_v46  ;;  %v579_v46 = vsel %vm475_vm0, %v574_v29, %v578_v30  ;;  %v566_v53 = vor.u32 %v564_v42, %v554_v27  ;;  %v3248_v27 = vld [vmem:[#allocation2 + $0x2a4] ss:$16 sps:$4 sm:$0xff]   ;;  %v3246_v29 = vld [vmem:[#allocation2 + $0x2a0] ss:$16 sps:$4 sm:$0xff]   ;;  %v3249_v30 = vld [vmem:[#allocation2 + $0x2a8] ss:$16 sps:$4 sm:$0xff]   ;;  %p3369_p5 = por %p3368_p3, %p3367_p1 }
  0x71   : > { %2637 = vmatprep.mubr.msk.bf16.mxu0 %vm820_vm1, %v547_v51  ;;  %2645 = vmatprep.mubr.msk.bf16.mxu1 %vm820_vm1, %v547_v51  ;;  %v3236_v51 = vld [vmem:[#allocation2 + $0x124] ss:$16 sps:$4 sm:$0xff]   ;;  %v3263_v42 = vld [vmem:[#allocation2 + $0x2ec] ss:$16 sps:$4 sm:$0xff]  }
  0x72   : > { %1296 = vmatpush1.bf16.msra.mxu0 %v3195_v49  ;;  %1409 = vmatpush1.bf16.msra.mxu1 %v3198_v52  ;;  %v3231_v49 = vld [vmem:[#allocation2 + $0x108] ss:$16 sps:$4 sm:$0xff]   ;;  %v3239_v52 = vld [vmem:[#allocation2 + $0x12c] ss:$16 sps:$4 sm:$0xff]   ;;  %v571_v2 = vsel %vm475_vm0, %v566_v53, %v570_v55  ;;  %v3278_v55 = vld [vmem:[#allocation2 + $0x344] ss:$16 sps:$4 sm:$0xff]   ;;  %p3370_p6 = pnand %p3369_p5, %p3363_p13 }
  0x73   : > { %1297 = vmatprep.subr.bf16.mxu0 %v3206_v58  ;;  %1410 = vmatprep.subr.bf16.mxu1 %v3209_v59  ;;  %v594_v58 = vrot.slane %v592_v47, 1  ;;  %v3682_v59 = vpack.c.bf16 %v334_v50, %v334_v50  ;;  %v3269_v47 = vld [vmem:[#allocation2 + $0x30c] ss:$16 sps:$4 sm:$0xff]   ;;  %v3272_v50 = vld [vmem:[#allocation2 + $0x324] ss:$16 sps:$4 sm:$0xff]  }
  0x74   : > { %v3273_v53 = vld [vmem:[#allocation2 + $0x328] ss:$16 sps:$4 sm:$0xff]  }
  0x75   : > { %v595_v7 = vsel %vm475_vm0, %v590_v57, %v594_v58  ;;  %v3281_v57 = vld [vmem:[#allocation2 + $0x34c] ss:$16 sps:$4 sm:$0xff]  }
  0x76   : > { %1298 = vmatpush1.bf16.msra.mxu0 %v3204_v61  ;;  %1411 = vmatpush1.bf16.msra.mxu1 %v3207_v1  ;;  %v3234_v61 = vld [vmem:[#allocation2 + $0x120] ss:$16 sps:$4 sm:$0xff]   ;;  %v3245_v1 = vld [vmem:[#allocation2 + $0x28c] ss:$16 sps:$4 sm:$0xff]  }
  0x77   : > { %1299 = vmatprep.subr.bf16.mxu0 %v3214_v8  ;;  %1412 = vmatprep.subr.bf16.mxu1 %v3217_v9  ;;  %v604_v8 = vshrl.u32 %v3669_v32, 16  ;;  %v608_v9 = vshll.u32 %v3682_v59, 16 }
  0x78   : > { %908 = vmatmul.mubr.bf16.gmra.mrb[12].mxu0 %v539_v11  ;;  %1021 = vmatmul.mubr.bf16.gmra.mrb[12].mxu1 %v539_v11  ;;  %v586_v11 = vrot.slane %v584_v5, 1  ;;  %v3293_v5 = vld [vmem:[#allocation2 + $0x38c] ss:$16 sps:$4 sm:$0xff]  }
  0x79   : > { %2638 = vmatprep.mubr.msk.bf16.mxu0 %vm820_vm1, %v563_v15  ;;  %2646 = vmatprep.mubr.msk.bf16.mxu1 %vm820_vm1, %v563_v15  ;;  %v606_v13 = vor.u32 %v604_v8, %v594_v58  ;;  %v610_v14 = vrot.slane %v608_v9, 1  ;;  %v3276_v58 = vld [vmem:[#allocation2 + $0x340] ss:$16 sps:$4 sm:$0xff]   ;;  %v3291_v8 = vld [vmem:[#allocation2 + $0x388] ss:$16 sps:$4 sm:$0xff]  }
  0x7a   : > { %1300 = vmatpush1.bf16.msra.mxu0 %v3212_v17  ;;  %1413 = vmatpush1.bf16.msra.mxu1 %v3215_v20  ;;  %v587_v15 = vsel %vm475_vm0, %v582_v10, %v586_v11  ;;  %v600_v17 = vshll.u32 %v3692_v12, 16  ;;  %v598_v21 = vor.u32 %v596_v16, %v586_v11  ;;  %v3296_v9 = vld [vmem:[#allocation2 + $0x3a4] ss:$16 sps:$4 sm:$0xff]   ;;  %v3299_v10 = vld [vmem:[#allocation2 + $0x3ac] ss:$16 sps:$4 sm:$0xff]  }
  0x7b   : > { %1301 = vmatprep.subr.bf16.mxu0 %v3221_v23  ;;  %1414 = vmatprep.subr.bf16.mxu1 %v3224_v24  ;;  %v611_v20 = vsel %vm475_vm0, %v606_v13, %v610_v14  ;;  %v3240_v24 = vld [vmem:[#allocation2 + $0x280] ss:$16 sps:$4 sm:$0xff]   ;;  %v2201_v13 = vld [vmem:[%s3976_s3 + $0x88] sm:$0xff] }
  0x7c   : > { %v602_v22 = vrot.slane %v600_v17, 1  ;;  %v2200_v11 = vld [vmem:[%s3976_s3 + $0x80] sm:$0xff]  ;;  %v1535_v17 = vrot.slane %v3580_v34, 1 }
  0x7d   : > { %v3294_v14 = vld [vmem:[#allocation2 + $0x3a0] ss:$16 sps:$4 sm:$0xff]   ;;  %v2849_v16 = vpack.c.bf16 %v2201_v13, %v2200_v11  ;;  %v1546_v11 = vrot.slane %v3632_v38, 1  ;;  %v1552_v13 = vrot.slane %v3637_v45, 1 }
  0x7e   : > { %1302 = vmatpush1.bf16.msra.mxu0 %v3219_v28  ;;  %1415 = vmatpush1.bf16.msra.mxu1 %v3222_v31  ;;  %v603_v23 = vsel %vm475_vm0, %v598_v21, %v602_v22  ;;  %v3251_v28 = vld [vmem:[#allocation2 + $0x2ac] ss:$16 sps:$4 sm:$0xff]   ;;  %v3254_v31 = vld [vmem:[#allocation2 + $0x2c4] ss:$16 sps:$4 sm:$0xff]   ;;  %v1532_v22 = vrot.slane %v3586_v36, 1 }
  0x7f   : > { %1303 = vmatprep.subr.bf16.mxu0 %v3230_v39  ;;  %1416 = vmatprep.subr.bf16.mxu1 %v3233_v40  ;;  %v3252_v39 = vld [vmem:[#allocation2 + $0x2c0] ss:$16 sps:$4 sm:$0xff]   ;;  %v3255_v40 = vld [vmem:[#allocation2 + $0x2c8] ss:$16 sps:$4 sm:$0xff]  }
  0x80   : > { %918 = vmatmul.mubr.bf16.gmra.mrb[16].mxu0 %v555_v41  ;;  %1031 = vmatmul.mubr.bf16.gmra.mrb[16].mxu1 %v555_v41  ;;  %v3260_v41 = vld [vmem:[#allocation2 + $0x2e4] ss:$16 sps:$4 sm:$0xff]  }
  0x81   : > { %2639 = vmatprep.mubr.msk.bf16.mxu0 %vm820_vm1, %v579_v46  ;;  %2647 = vmatprep.mubr.msk.bf16.mxu1 %vm820_vm1, %v579_v46  ;;  %v3266_v46 = vld [vmem:[#allocation2 + $0x304] ss:$16 sps:$4 sm:$0xff]  }
  0x82   : > { %1304 = vmatpush1.bf16.msra.mxu0 %v3228_v48  ;;  %1417 = vmatpush1.bf16.msra.mxu1 %v3231_v49  ;;  %v3264_v48 = vld [vmem:[#allocation2 + $0x300] ss:$16 sps:$4 sm:$0xff]   ;;  %v3267_v49 = vld [vmem:[#allocation2 + $0x308] ss:$16 sps:$4 sm:$0xff]  }
  0x83   : > { %1305 = vmatprep.subr.bf16.mxu0 %v3236_v51  ;;  %1418 = vmatprep.subr.bf16.mxu1 %v3239_v52  ;;  %v3275_v51 = vld [vmem:[#allocation2 + $0x32c] ss:$16 sps:$4 sm:$0xff]   ;;  %v3270_v52 = vld [vmem:[#allocation2 + $0x320] ss:$16 sps:$4 sm:$0xff]  }
  0x86   : > { %1306 = vmatpush1.bf16.msra.mxu0 %v3234_v61  ;;  %1419 = vmatpush1.bf16.msra.mxu1 %v3237_v63  ;;  %v3279_v61 = vld [vmem:[#allocation2 + $0x348] ss:$16 sps:$4 sm:$0xff]   ;;  %v3284_v63 = vld [vmem:[#allocation2 + $0x364] ss:$16 sps:$4 sm:$0xff]  }
  0x87   : > { %1798 = vmatprep.subr.bf16.mxu0 %v3242_v0  ;;  %1911 = vmatprep.subr.bf16.mxu1 %v3245_v1  ;;  %v3287_v0 = vld [vmem:[#allocation2 + $0x36c] ss:$16 sps:$4 sm:$0xff]   ;;  %v3282_v1 = vld [vmem:[#allocation2 + $0x360] ss:$16 sps:$4 sm:$0xff]  }
  0x88   : > { %928 = vmatmul.mubr.bf16.gmra.mrb[20].mxu0 %v571_v2  ;;  %1041 = vmatmul.mubr.bf16.gmra.mrb[20].mxu1 %v571_v2  ;;  %v3285_v2 = vld [vmem:[#allocation2 + $0x368] ss:$16 sps:$4 sm:$0xff]  }
  0x89   : > { %2640 = vmatprep.mubr.msk.bf16.mxu0 %vm820_vm1, %v595_v7  ;;  %2648 = vmatprep.mubr.msk.bf16.mxu1 %vm820_vm1, %v595_v7  ;;  %v3288_v7 = vld [vmem:[#allocation2 + $0x380] ss:$16 sps:$4 sm:$0xff]  }
  0x90   : > { %938 = vmatmul.mubr.bf16.gmra.mrb[24].mxu0 %v587_v15  ;;  %1051 = vmatmul.mubr.bf16.gmra.mrb[24].mxu1 %v587_v15  ;;  %v3297_v15 = vld [vmem:[#allocation2 + $0x3a8] ss:$16 sps:$4 sm:$0xff]  }
  0x91   : > { %2641 = vmatprep.mubr.msk.bf16.mxu0 %vm820_vm1, %v611_v20  ;;  %2649 = vmatprep.mubr.msk.bf16.mxu1 %vm820_vm1, %v611_v20  ;;  %v1536_v20 = vrot.slane %v3583_v35, 1 }
  0x93   : > { %v1537_v21 = vsel %vm1531_vm2, %v1535_v17, %v1536_v20  ;;  %v2197_v17 = vld [vmem:[%s3976_s3 + $0x68] sm:$0xff] }
  0x98   : > { %948 = vmatmul.mubr.bf16.gmra.mrb[28].mxu0 %v603_v23  ;;  %1061 = vmatmul.mubr.bf16.gmra.mrb[28].mxu1 %v603_v23  ;;  %v1533_v23 = vrot.slane %v3589_v37, 1 }
  0x99   : > { %2690 = vmatprep.mubr.msk.bf16.mxu0 %vm820_vm1, %v3580_v34  ;;  %2698 = vmatprep.mubr.msk.bf16.mxu1 %vm820_vm1, %v3580_v34  ;;  %v2184_v34 = vld [vmem:[%s3976_s3] sm:$0xff] }
  0xa0   : > { %1320 = vmatmul.mubr.bf16.vlgmr.msra.gmra.mrb[0].mxu0 %v3586_v36  ;;  %1433 = vmatmul.mubr.bf16.vlgmr.msra.gmra.mrb[0].mxu1 %v3586_v36  ;;  %v2203_v36 = vld [vmem:[%s3976_s3 + $0x98] sm:$0xff] }
  0xa1   : > { %1799 = vmatpush1.bf16.msra.mxu0 %v3240_v24  ;;  %1912 = vmatpush1.bf16.msra.mxu1 %v3243_v26  ;;  %v1540_v24 = vrot.slane %v3599_v54, 1  ;;  %v2202_v26 = vld [vmem:[%s3976_s3 + $0x90] sm:$0xff] }
  0xa2   : > { %2691 = vmatprep.mubr.msk.bf16.mxu0 %vm820_vm1, %v3583_v35  ;;  %2699 = vmatprep.mubr.msk.bf16.mxu1 %vm820_vm1, %v3583_v35  ;;  %v2185_v35 = vld [vmem:[%s3976_s3 + $0x8] sm:$0xff] }
  0xa3   : > { %1800 = vmatprep.subr.bf16.mxu0 %v3248_v27  ;;  %1913 = vmatprep.subr.bf16.mxu1 %v3251_v28  ;;  %v2851_v27 = vpack.c.bf16 %v2185_v35, %v2184_v34  ;;  %v2853_v28 = vpack.c.bf16 %v2203_v36, %v2202_v26  ;;  %v1556_v34 = vrot.slane %v3655_v4, 1  ;;  %v1554_v36 = vrot.slane %v3664_v25, 1 }
  0xa5   : > { %1801 = vmatpush1.bf16.msra.mxu0 %v3246_v29  ;;  %1914 = vmatpush1.bf16.msra.mxu1 %v3249_v30  ;;  %v2186_v29 = vld [vmem:[%s3976_s3 + $0x10] sm:$0xff]  ;;  %v2187_v30 = vld [vmem:[%s3976_s3 + $0x18] sm:$0xff]  ;;  %v1557_v26 = vsel %vm1531_vm2, %v1552_v13, %v1556_v34 }
  0xa6   : > { %1802 = vmatprep.subr.bf16.mxu0 %v3254_v31  ;;  %1915 = vmatprep.subr.bf16.mxu1 %v3257_v33  ;;  %v2204_v31 = vld [vmem:[%s3976_s3 + $0xa0] sm:$0xff]  ;;  %v2205_v33 = vld [vmem:[%s3976_s3 + $0xa8] sm:$0xff] }
  0xa8   : > { %1330 = vmatmul.mubr.bf16.gmra.mrb[4].mxu0 %v3589_v37  ;;  %1443 = vmatmul.mubr.bf16.gmra.mrb[4].mxu1 %v3589_v37  ;;  %v1534_v37 = vsel %vm1531_vm2, %v1532_v22, %v1533_v23 }
  0xa9   : > { %1803 = vmatpush1.bf16.msra.mxu0 %v3252_v39  ;;  %1916 = vmatpush1.bf16.msra.mxu1 %v3255_v40  ;;  %v1538_v39 = vrot.slane %v3604_v62, 1  ;;  %v1544_v40 = vrot.slane %v3612_v6, 1 }
  0xaa   : > { %2692 = vmatprep.mubr.msk.bf16.mxu0 %vm820_vm1, %v3599_v54  ;;  %2700 = vmatprep.mubr.msk.bf16.mxu1 %vm820_vm1, %v3599_v54  ;;  %v1541_v54 = vsel %vm1531_vm2, %v1536_v20, %v1540_v24 }
  0xab   : > { %1804 = vmatprep.subr.bf16.mxu0 %v3260_v41  ;;  %1917 = vmatprep.subr.bf16.mxu1 %v3263_v42  ;;  %v2855_v41 = vpack.c.bf16 %v2187_v30, %v2186_v29  ;;  %v2857_v42 = vpack.c.bf16 %v2205_v33, %v2204_v31 }
  0xad   : > { %1805 = vmatpush1.bf16.msra.mxu0 %v3258_v43  ;;  %1918 = vmatpush1.bf16.msra.mxu1 %v3261_v44  ;;  %v2188_v43 = vld [vmem:[%s3976_s3 + $0x20] sm:$0xff]  ;;  %v2189_v44 = vld [vmem:[%s3976_s3 + $0x28] sm:$0xff] }
  0xae   : > { %1806 = vmatprep.subr.bf16.mxu0 %v3266_v46  ;;  %1919 = vmatprep.subr.bf16.mxu1 %v3269_v47  ;;  %v1539_v46 = vsel %vm1531_vm2, %v1533_v23, %v1538_v39  ;;  %v1545_v47 = vsel %vm1531_vm2, %v1540_v24, %v1544_v40  ;;  %v1550_v24 = vrot.slane %v3647_v60, 1 }
  0xb0   : > { %1340 = vmatmul.mubr.bf16.gmra.mrb[8].mxu0 %v3604_v62  ;;  %1453 = vmatmul.mubr.bf16.gmra.mrb[8].mxu1 %v3604_v62  ;;  %v2206_v62 = vld [vmem:[%s3976_s3 + $0xb0] sm:$0xff]  ;;  %v1551_v35 = vsel %vm1531_vm2, %v1546_v11, %v1550_v24 }
  0xb1   : > { %2693 = vmatprep.mubr.msk.bf16.mxu0 %vm820_vm1, %v3612_v6  ;;  %2701 = vmatprep.mubr.msk.bf16.mxu1 %vm820_vm1, %v3612_v6  ;;  %v2207_v6 = vld [vmem:[%s3976_s3 + $0xb8] sm:$0xff] }
  0xb2   : > { %1807 = vmatpush1.bf16.msra.mxu0 %v3264_v48  ;;  %1920 = vmatpush1.bf16.msra.mxu1 %v3267_v49  ;;  %v2859_v48 = vpack.c.bf16 %v2189_v44, %v2188_v43  ;;  %v2861_v49 = vpack.c.bf16 %v2207_v6, %v2206_v62 }
  0xb3   : > { %1808 = vmatprep.subr.bf16.mxu0 %v3272_v50  ;;  %1921 = vmatprep.subr.bf16.mxu1 %v3275_v51  ;;  %v2190_v50 = vld [vmem:[%s3976_s3 + $0x30] sm:$0xff]  ;;  %v2191_v51 = vld [vmem:[%s3976_s3 + $0x38] sm:$0xff] }
  0xb6   : > { %1809 = vmatpush1.bf16.msra.mxu0 %v3270_v52  ;;  %1922 = vmatpush1.bf16.msra.mxu1 %v3273_v53  ;;  %v2208_v52 = vld [vmem:[%s3976_s3 + $0xc0] sm:$0xff]  ;;  %v2209_v53 = vld [vmem:[%s3976_s3 + $0xc8] sm:$0xff] }
  0xb7   : > { %1810 = vmatprep.subr.bf16.mxu0 %v3278_v55  ;;  %1923 = vmatprep.subr.bf16.mxu1 %v3281_v57  ;;  %v1542_v55 = vrot.slane %v3618_v18, 1  ;;  %v1548_v57 = vrot.slane %v3623_v19, 1 }
  0xb8   : > { %1350 = vmatmul.mubr.bf16.gmra.mrb[12].mxu0 %v3618_v18  ;;  %1463 = vmatmul.mubr.bf16.gmra.mrb[12].mxu1 %v3618_v18  ;;  %v2210_v18 = vld [vmem:[%s3976_s3 + $0xd0] sm:$0xff] }
  0xb9   : > { %2694 = vmatprep.mubr.msk.bf16.mxu0 %vm820_vm1, %v3623_v19  ;;  %2702 = vmatprep.mubr.msk.bf16.mxu1 %vm820_vm1, %v3623_v19  ;;  %v2211_v19 = vld [vmem:[%s3976_s3 + $0xd8] sm:$0xff]  ;;  %v1547_v20 = vsel %vm1531_vm2, %v1542_v55, %v1546_v11 }
  0xba   : > { %1811 = vmatpush1.bf16.msra.mxu0 %v3276_v58  ;;  %1924 = vmatpush1.bf16.msra.mxu1 %v3279_v61  ;;  %v2863_v58 = vpack.c.bf16 %v2191_v51, %v2190_v50  ;;  %v2865_v61 = vpack.c.bf16 %v2209_v53, %v2208_v52 }
  0xbb   : > { %1812 = vmatprep.subr.bf16.mxu0 %v3284_v63  ;;  %1925 = vmatprep.subr.bf16.mxu1 %v3287_v0  ;;  %v2192_v63 = vld [vmem:[%s3976_s3 + $0x40] sm:$0xff]  ;;  %v2193_v0 = vld [vmem:[%s3976_s3 + $0x48] sm:$0xff] }
  0xbe   : > { %1813 = vmatpush1.bf16.msra.mxu0 %v3282_v1  ;;  %1926 = vmatpush1.bf16.msra.mxu1 %v3285_v2  ;;  %v1543_v1 = vsel %vm1531_vm2, %v1538_v39, %v1542_v55  ;;  %v1549_v2 = vsel %vm1531_vm2, %v1544_v40, %v1548_v57 }
  0xbf   : > { %1814 = vmatprep.subr.bf16.mxu0 %v3290_v3  ;;  %1927 = vmatprep.subr.bf16.mxu1 %v3293_v5  ;;  %v2867_v3 = vpack.c.bf16 %v2193_v0, %v2192_v63  ;;  %v2869_v5 = vpack.c.bf16 %v2211_v19, %v2210_v18 }
  0xc0   : > { %1360 = vmatmul.mubr.bf16.gmra.mrb[16].mxu0 %v3632_v38  ;;  %1473 = vmatmul.mubr.bf16.gmra.mrb[16].mxu1 %v3632_v38  ;;  %v2214_v38 = vld [vmem:[%s3976_s3 + $0xf0] sm:$0xff] }
  0xc1   : > { %2695 = vmatprep.mubr.msk.bf16.mxu0 %vm820_vm1, %v3637_v45  ;;  %2703 = vmatprep.mubr.msk.bf16.mxu1 %vm820_vm1, %v3637_v45  ;;  %v2215_v45 = vld [vmem:[%s3976_s3 + $0xf8] sm:$0xff] }
  0xc2   : > { %1815 = vmatpush1.bf16.msra.mxu0 %v3288_v7  ;;  %1928 = vmatpush1.bf16.msra.mxu1 %v3291_v8  ;;  %v2194_v7 = vld [vmem:[%s3976_s3 + $0x50] sm:$0xff]  ;;  %v2195_v8 = vld [vmem:[%s3976_s3 + $0x58] sm:$0xff]  ;;  %v2877_v23 = vpack.c.bf16 %v2215_v45, %v2214_v38 }
  0xc3   : > { %1816 = vmatprep.subr.bf16.mxu0 %v3296_v9  ;;  %1929 = vmatprep.subr.bf16.mxu1 %v3299_v10  ;;  %v2212_v9 = vld [vmem:[%s3976_s3 + $0xe0] sm:$0xff]  ;;  %v2213_v10 = vld [vmem:[%s3976_s3 + $0xe8] sm:$0xff] }
  0xc6   : > { %1817 = vmatpush1.bf16.msra.mxu0 %v3294_v14  ;;  %1930 = vmatpush1.bf16.msra.mxu1 %v3297_v15  ;;  %v2871_v14 = vpack.c.bf16 %v2195_v8, %v2194_v7  ;;  %v2873_v15 = vpack.c.bf16 %v2213_v10, %v2212_v9 }
  0xc7   : > { %2850 = vmatprep.subr.bf16.mxu0 %v2849_v16  ;;  %2881 = vmatprep.subr.bf16.mxu1 %v2849_v16  ;;  %v2196_v16 = vld [vmem:[%s3976_s3 + $0x60] sm:$0xff] }
  0xc8   : > { %1370 = vmatmul.mubr.bf16.gmra.mrb[20].mxu0 %v3647_v60  ;;  %1483 = vmatmul.mubr.bf16.gmra.mrb[20].mxu1 %v3647_v60  ;;  %v2875_v22 = vpack.c.bf16 %v2197_v17, %v2196_v16  ;;  %v1560_v60 = vrot.slane %v3669_v32, 1 }
  0xc9   : > { %2696 = vmatprep.mubr.msk.bf16.mxu0 %vm820_vm1, %v3655_v4  ;;  %2704 = vmatprep.mubr.msk.bf16.mxu1 %vm820_vm1, %v3655_v4  ;;  %v1555_v4 = vsel %vm1531_vm2, %v1550_v24, %v1554_v36 }
  0xd0   : > { %1380 = vmatmul.mubr.bf16.gmra.mrb[24].mxu0 %v3664_v25  ;;  %1493 = vmatmul.mubr.bf16.gmra.mrb[24].mxu1 %v3664_v25 }
  0xd1   : > { %2697 = vmatprep.mubr.msk.bf16.mxu0 %vm820_vm1, %v3669_v32  ;;  %2705 = vmatprep.mubr.msk.bf16.mxu1 %vm820_vm1, %v3669_v32  ;;  %v1562_v32 = vrot.slane %v3692_v12, 1 }
  0xd8   : > { %1390 = vmatmul.mubr.bf16.gmra.mrb[28].mxu0 %v3680_v56  ;;  %1503 = vmatmul.mubr.bf16.gmra.mrb[28].mxu1 %v3680_v56 }
  0xd9   : > { %2746 = vmatprep.mubr.msk.bf16.mxu0 %vm820_vm1, %v1537_v21  ;;  %2754 = vmatprep.mubr.msk.bf16.mxu1 %vm820_vm1, %v1537_v21  ;;  %v1553_v21 = vsel %vm1531_vm2, %v1548_v57, %v1552_v13 }
  0xe0   : > { %1831 = vmatmul.mubr.bf16.vlgmr.msra.gmra.mrb[0].mxu0 %v1534_v37  ;;  %1944 = vmatmul.mubr.bf16.vlgmr.msra.gmra.mrb[0].mxu1 %v1534_v37  ;;  %v1561_v37 = vsel %vm1531_vm2, %v1556_v34, %v1560_v60 }
  0xe1   : > { %2747 = vmatprep.mubr.msk.bf16.mxu0 %vm820_vm1, %v1541_v54  ;;  %2755 = vmatprep.mubr.msk.bf16.mxu1 %vm820_vm1, %v1541_v54  ;;  %v1558_v54 = vrot.slane %v3680_v56, 1  ;;  %v2198_v56 = vld [vmem:[%s3976_s3 + $0x70] sm:$0xff] }
  0xe2   : > { %2852 = vmatpush3.bf16.msra.mxu0 %v2851_v27  ;;  %2889 = vmatpush3.bf16.msra.mxu1 %v2851_v27  ;;  %v1564_v27 = vrot.slane %v3682_v59, 1  ;;  %v2199_v59 = vld [vmem:[%s3976_s3 + $0x78] sm:$0xff] }
  0xe3   : > { %2854 = vmatprep.subr.bf16.mxu0 %v2853_v28  ;;  %2882 = vmatprep.subr.bf16.mxu1 %v2853_v28  ;;  %v1559_v28 = vsel %vm1531_vm2, %v1554_v36, %v1558_v54  ;;  %v1563_v29 = vsel %vm1531_vm2, %v1558_v54, %v1562_v32  ;;  %v2879_v30 = vpack.c.bf16 %v2199_v59, %v2198_v56 }
  0xe4   : > { %v1565_v25 = vsel %vm1531_vm2, %v1560_v60, %v1564_v27 }
  0xe6   : > { %2856 = vmatpush3.bf16.msra.mxu0 %v2855_v41  ;;  %2890 = vmatpush3.bf16.msra.mxu1 %v2855_v41 }
  0xe7   : > { %2858 = vmatprep.subr.bf16.mxu0 %v2857_v42  ;;  %2883 = vmatprep.subr.bf16.mxu1 %v2857_v42 }
  0xe8   : > { %1841 = vmatmul.mubr.bf16.gmra.mrb[4].mxu0 %v1539_v46  ;;  %1954 = vmatmul.mubr.bf16.gmra.mrb[4].mxu1 %v1539_v46 }
  0xe9   : > { %2748 = vmatprep.mubr.msk.bf16.mxu0 %vm820_vm1, %v1545_v47  ;;  %2756 = vmatprep.mubr.msk.bf16.mxu1 %vm820_vm1, %v1545_v47 }
  0xea   : > { %2860 = vmatpush3.bf16.msra.mxu0 %v2859_v48  ;;  %2891 = vmatpush3.bf16.msra.mxu1 %v2859_v48 }
  0xeb   : > { %2862 = vmatprep.subr.bf16.mxu0 %v2861_v49  ;;  %2884 = vmatprep.subr.bf16.mxu1 %v2861_v49 }
  0xee   : > { %2864 = vmatpush3.bf16.msra.mxu0 %v2863_v58  ;;  %2892 = vmatpush3.bf16.msra.mxu1 %v2863_v58 }
  0xef   : > { %2866 = vmatprep.subr.bf16.mxu0 %v2865_v61  ;;  %2885 = vmatprep.subr.bf16.mxu1 %v2865_v61 }
  0xf0   : > { %1851 = vmatmul.mubr.bf16.gmra.mrb[8].mxu0 %v1543_v1  ;;  %1964 = vmatmul.mubr.bf16.gmra.mrb[8].mxu1 %v1543_v1 }
  0xf1   : > { %2749 = vmatprep.mubr.msk.bf16.mxu0 %vm820_vm1, %v1549_v2  ;;  %2757 = vmatprep.mubr.msk.bf16.mxu1 %vm820_vm1, %v1549_v2 }
  0xf2   : > { %2868 = vmatpush3.bf16.msra.mxu0 %v2867_v3  ;;  %2893 = vmatpush3.bf16.msra.mxu1 %v2867_v3 }
  0xf3   : > { %2870 = vmatprep.subr.bf16.mxu0 %v2869_v5  ;;  %2886 = vmatprep.subr.bf16.mxu1 %v2869_v5 }
  0xf6   : > { %2872 = vmatpush3.bf16.msra.mxu0 %v2871_v14  ;;  %2894 = vmatpush3.bf16.msra.mxu1 %v2871_v14 }
  0xf7   : > { %2874 = vmatprep.subr.bf16.mxu0 %v2873_v15  ;;  %2887 = vmatprep.subr.bf16.mxu1 %v2873_v15 }
  0xf8   : > { %1861 = vmatmul.mubr.bf16.gmra.mrb[12].mxu0 %v1547_v20  ;;  %1974 = vmatmul.mubr.bf16.gmra.mrb[12].mxu1 %v1547_v20 }
  0xf9   : > { %2750 = vmatprep.mubr.msk.bf16.mxu0 %vm820_vm1, %v1553_v21  ;;  %2758 = vmatprep.mubr.msk.bf16.mxu1 %vm820_vm1, %v1553_v21 }
  0xfa   : > { %2876 = vmatpush3.bf16.msra.mxu0 %v2875_v22  ;;  %2895 = vmatpush3.bf16.msra.mxu1 %v2875_v22 }
  0xfb   : > { %2878 = vmatprep.subr.bf16.mxu0 %v2877_v23  ;;  %2888 = vmatprep.subr.bf16.mxu1 %v2877_v23 }
  0xfe   : > { %2880 = vmatpush3.bf16.msra.mxu0 %v2879_v30  ;;  %2896 = vmatpush3.bf16.msra.mxu1 %v2879_v30 }
 0x100   : > { %1871 = vmatmul.mubr.bf16.gmra.mrb[16].mxu0 %v1551_v35  ;;  %1984 = vmatmul.mubr.bf16.gmra.mrb[16].mxu1 %v1551_v35 }
 0x101   : > { %2751 = vmatprep.mubr.msk.bf16.mxu0 %vm820_vm1, %v1557_v26  ;;  %2759 = vmatprep.mubr.msk.bf16.mxu1 %vm820_vm1, %v1557_v26 }
 0x108   : > { %1881 = vmatmul.mubr.bf16.gmra.mrb[20].mxu0 %v1555_v4  ;;  %1994 = vmatmul.mubr.bf16.gmra.mrb[20].mxu1 %v1555_v4 }
 0x109   : > { %2752 = vmatprep.mubr.msk.bf16.mxu0 %vm820_vm1, %v1561_v37  ;;  %2760 = vmatprep.mubr.msk.bf16.mxu1 %vm820_vm1, %v1561_v37 }
 0x110   : > { %1891 = vmatmul.mubr.bf16.gmra.mrb[24].mxu0 %v1559_v28  ;;  %2004 = vmatmul.mubr.bf16.gmra.mrb[24].mxu1 %v1559_v28 }
 0x111   : > { %2753 = vmatprep.mubr.msk.bf16.mxu0 %vm820_vm1, %v1565_v25  ;;  %2761 = vmatprep.mubr.msk.bf16.mxu1 %vm820_vm1, %v1565_v25 }
 0x118   : > { %1901 = vmatmul.mubr.bf16.gmra.mrb[28].mxu0 %v1563_v29  ;;  %2014 = vmatmul.mubr.bf16.gmra.mrb[28].mxu1 %v1563_v29 }
 0x1b3   : > { %v1832_v31 = vpop.f32.mrb[0].mxu0  ;;  %v1945_v33 = vpop.f32.mrb[0].mxu1 }
 0x1b4   : > { %v2088_v39 = vmul.f32 %v1832_v31, %v1832_v31  ;;  %v2120_v40 = vmul.f32 %v1945_v33, %v1945_v33  ;;  %v1834_v12 = vpop.f32.mrb[1].mxu0  ;;  %v1947_v41 = vpop.f32.mrb[1].mxu1 }
 0x1b5   : > { %v2089_v42 = vmul.f32 %v1834_v12, %v1834_v12  ;;  %v2121_v43 = vmul.f32 %v1947_v41, %v1947_v41  ;;  %v1836_v44 = vpop.f32.mrb[2].mxu0  ;;  %v1949_v62 = vpop.f32.mrb[2].mxu1 }
 0x1b6   : > { %v2152_v6 = vadd.f32 %v2120_v40, %v2088_v39  ;;  %v2090_v46 = vmul.f32 %v1836_v44, %v1836_v44  ;;  %v2122_v47 = vmul.f32 %v1949_v62, %v1949_v62  ;;  %v1838_v48 = vpop.f32.mrb[3].mxu0  ;;  %v1951_v49 = vpop.f32.mrb[3].mxu1 }
 0x1b7   : > { %v2153_v50 = vadd.f32 %v2121_v43, %v2089_v42  ;;  %v2091_v51 = vmul.f32 %v1838_v48, %v1838_v48  ;;  %v2123_v52 = vmul.f32 %v1951_v49, %v1951_v49 }
 0x1b8   : > { %v2154_v53 = vadd.f32 %v2122_v47, %v2090_v46 }
 0x1b9   : > { %v2155_v55 = vadd.f32 %v2123_v52, %v2091_v51  ;;  %2280 = vmatprep.mubr.f32.mxu0 %v2153_v50 }
 0x1ba   : > { %2281 = vmatmul.mubr.f32.vlgmr.msra.gmra.mrb[32].mxu0 %v2152_v6 }
 0x1bb   : > { %v1842_v57 = vpop.f32.mrb[4].mxu0  ;;  %v1955_v58 = vpop.f32.mrb[4].mxu1  ;;  %2285 = vmatprep.mubr.f32.mxu0 %v2155_v55 }
 0x1bc   : > { %v2092_v61 = vmul.f32 %v1842_v57, %v1842_v57  ;;  %v2124_v63 = vmul.f32 %v1955_v58, %v1955_v58  ;;  %v1844_v0 = vpop.f32.mrb[5].mxu0  ;;  %v1957_v18 = vpop.f32.mrb[5].mxu1 }
 0x1bd   : > { %v2093_v19 = vmul.f32 %v1844_v0, %v1844_v0  ;;  %v2125_v1 = vmul.f32 %v1957_v18, %v1957_v18  ;;  %v1846_v2 = vpop.f32.mrb[6].mxu0  ;;  %v1959_v3 = vpop.f32.mrb[6].mxu1 }
 0x1be   : > { %v2156_v5 = vadd.f32 %v2124_v63, %v2092_v61  ;;  %v2094_v7 = vmul.f32 %v1846_v2, %v1846_v2  ;;  %v2126_v8 = vmul.f32 %v1959_v3, %v1959_v3  ;;  %v1848_v9 = vpop.f32.mrb[7].mxu0  ;;  %v1961_v10 = vpop.f32.mrb[7].mxu1  ;;  %2286 = vmatmul.mubr.f32.gmra.mrb[34].mxu0 %v2154_v53 }
 0x1bf   : > { %v2157_v11 = vadd.f32 %v2125_v1, %v2093_v19  ;;  %v2095_v13 = vmul.f32 %v1848_v9, %v1848_v9  ;;  %v2127_v14 = vmul.f32 %v1961_v10, %v1961_v10 }
 0x1c0   : > { %v2158_v15 = vadd.f32 %v2126_v8, %v2094_v7 }
 0x1c1   : > { %v2159_v16 = vadd.f32 %v2127_v14, %v2095_v13  ;;  %2290 = vmatprep.mubr.f32.mxu0 %v2157_v11 }
 0x1c2   : > { %2291 = vmatmul.mubr.f32.gmra.mrb[36].mxu0 %v2156_v5 }
 0x1c3   : > { %v1852_v17 = vpop.f32.mrb[8].mxu0  ;;  %v1965_v38 = vpop.f32.mrb[8].mxu1  ;;  %2295 = vmatprep.mubr.f32.mxu0 %v2159_v16 }
 0x1c4   : > { %v2096_v45 = vmul.f32 %v1852_v17, %v1852_v17  ;;  %v2128_v20 = vmul.f32 %v1965_v38, %v1965_v38  ;;  %v1854_v21 = vpop.f32.mrb[9].mxu0  ;;  %v1967_v22 = vpop.f32.mrb[9].mxu1 }
 0x1c5   : > { %v2097_v23 = vmul.f32 %v1854_v21, %v1854_v21  ;;  %v2129_v24 = vmul.f32 %v1967_v22, %v1967_v22  ;;  %v1856_v34 = vpop.f32.mrb[10].mxu0  ;;  %v1969_v35 = vpop.f32.mrb[10].mxu1 }
 0x1c6   : > { %v2160_v26 = vadd.f32 %v2128_v20, %v2096_v45  ;;  %v2098_v36 = vmul.f32 %v1856_v34, %v1856_v34  ;;  %v2130_v60 = vmul.f32 %v1969_v35, %v1969_v35  ;;  %v1858_v4 = vpop.f32.mrb[11].mxu0  ;;  %v1971_v37 = vpop.f32.mrb[11].mxu1  ;;  %2296 = vmatmul.mubr.f32.gmra.mrb[38].mxu0 %v2158_v15 }
 0x1c7   : > { %v2161_v54 = vadd.f32 %v2129_v24, %v2097_v23  ;;  %v2099_v27 = vmul.f32 %v1858_v4, %v1858_v4  ;;  %v2131_v28 = vmul.f32 %v1971_v37, %v1971_v37 }
 0x1c8   : > { %v2162_v25 = vadd.f32 %v2130_v60, %v2098_v36 }
 0x1c9   : > { %v2163_v32 = vadd.f32 %v2131_v28, %v2099_v27  ;;  %2300 = vmatprep.mubr.f32.mxu0 %v2161_v54 }
 0x1ca   : > { %2301 = vmatmul.mubr.f32.gmra.mrb[40].mxu0 %v2160_v26 }
 0x1cb   : > { %v1862_v29 = vpop.f32.mrb[12].mxu0  ;;  %v1975_v56 = vpop.f32.mrb[12].mxu1  ;;  %2305 = vmatprep.mubr.f32.mxu0 %v2163_v32 }
 0x1cc   : > { %v2100_v59 = vmul.f32 %v1862_v29, %v1862_v29  ;;  %v2132_v30 = vmul.f32 %v1975_v56, %v1975_v56  ;;  %v1864_v31 = vpop.f32.mrb[13].mxu0  ;;  %v1977_v33 = vpop.f32.mrb[13].mxu1 }
 0x1cd   : > { %v2101_v39 = vmul.f32 %v1864_v31, %v1864_v31  ;;  %v2133_v40 = vmul.f32 %v1977_v33, %v1977_v33  ;;  %v1866_v12 = vpop.f32.mrb[14].mxu0  ;;  %v1979_v41 = vpop.f32.mrb[14].mxu1 }
 0x1ce   : > { %v2164_v42 = vadd.f32 %v2132_v30, %v2100_v59  ;;  %v2102_v43 = vmul.f32 %v1866_v12, %v1866_v12  ;;  %v2134_v44 = vmul.f32 %v1979_v41, %v1979_v41  ;;  %v1868_v62 = vpop.f32.mrb[15].mxu0  ;;  %v1981_v6 = vpop.f32.mrb[15].mxu1  ;;  %2306 = vmatmul.mubr.f32.gmra.mrb[42].mxu0 %v2162_v25 }
 0x1cf   : > { %v2165_v46 = vadd.f32 %v2133_v40, %v2101_v39  ;;  %v2103_v47 = vmul.f32 %v1868_v62, %v1868_v62  ;;  %v2135_v48 = vmul.f32 %v1981_v6, %v1981_v6 }
 0x1d0   : > { %v2166_v49 = vadd.f32 %v2134_v44, %v2102_v43 }
 0x1d1   : > { %v2167_v50 = vadd.f32 %v2135_v48, %v2103_v47  ;;  %2310 = vmatprep.mubr.f32.mxu0 %v2165_v46 }
 0x1d2   : > { %2311 = vmatmul.mubr.f32.gmra.mrb[44].mxu0 %v2164_v42 }
 0x1d3   : > { %v1872_v51 = vpop.f32.mrb[16].mxu0  ;;  %v1985_v52 = vpop.f32.mrb[16].mxu1  ;;  %2315 = vmatprep.mubr.f32.mxu0 %v2167_v50 }
 0x1d4   : > { %v2104_v53 = vmul.f32 %v1872_v51, %v1872_v51  ;;  %v2136_v55 = vmul.f32 %v1985_v52, %v1985_v52  ;;  %v1874_v57 = vpop.f32.mrb[17].mxu0  ;;  %v1987_v58 = vpop.f32.mrb[17].mxu1 }
 0x1d5   : > { %v2105_v61 = vmul.f32 %v1874_v57, %v1874_v57  ;;  %v2137_v63 = vmul.f32 %v1987_v58, %v1987_v58  ;;  %v1876_v0 = vpop.f32.mrb[18].mxu0  ;;  %v1989_v18 = vpop.f32.mrb[18].mxu1 }
 0x1d6   : > { %v2168_v19 = vadd.f32 %v2136_v55, %v2104_v53  ;;  %v2106_v1 = vmul.f32 %v1876_v0, %v1876_v0  ;;  %v2138_v2 = vmul.f32 %v1989_v18, %v1989_v18  ;;  %v1878_v3 = vpop.f32.mrb[19].mxu0  ;;  %v1991_v5 = vpop.f32.mrb[19].mxu1  ;;  %2316 = vmatmul.mubr.f32.gmra.mrb[46].mxu0 %v2166_v49 }
 0x1d7   : > { %v2169_v7 = vadd.f32 %v2137_v63, %v2105_v61  ;;  %v2107_v8 = vmul.f32 %v1878_v3, %v1878_v3  ;;  %v2139_v9 = vmul.f32 %v1991_v5, %v1991_v5 }
 0x1d8   : > { %v2170_v10 = vadd.f32 %v2138_v2, %v2106_v1 }
 0x1d9   : > { %v2171_v11 = vadd.f32 %v2139_v9, %v2107_v8  ;;  %2320 = vmatprep.mubr.f32.mxu1 %v2169_v7 }
 0x1da   : > { %2321 = vmatmul.mubr.f32.vlgmr.msra.gmra.mrb[32].mxu1 %v2168_v19 }
 0x1db   : > { %v1882_v13 = vpop.f32.mrb[20].mxu0  ;;  %v1995_v14 = vpop.f32.mrb[20].mxu1  ;;  %2325 = vmatprep.mubr.f32.mxu1 %v2171_v11 }
 0x1dc   : > { %v2108_v15 = vmul.f32 %v1882_v13, %v1882_v13  ;;  %v2140_v16 = vmul.f32 %v1995_v14, %v1995_v14  ;;  %v1884_v17 = vpop.f32.mrb[21].mxu0  ;;  %v1997_v38 = vpop.f32.mrb[21].mxu1 }
 0x1dd   : > { %v2109_v45 = vmul.f32 %v1884_v17, %v1884_v17  ;;  %v2141_v20 = vmul.f32 %v1997_v38, %v1997_v38  ;;  %v1886_v21 = vpop.f32.mrb[22].mxu0  ;;  %v1999_v22 = vpop.f32.mrb[22].mxu1 }
 0x1de   : > { %v2172_v23 = vadd.f32 %v2140_v16, %v2108_v15  ;;  %v2110_v24 = vmul.f32 %v1886_v21, %v1886_v21  ;;  %v2142_v34 = vmul.f32 %v1999_v22, %v1999_v22  ;;  %v1888_v35 = vpop.f32.mrb[23].mxu0  ;;  %v2001_v26 = vpop.f32.mrb[23].mxu1  ;;  %2326 = vmatmul.mubr.f32.gmra.mrb[34].mxu1 %v2170_v10 }
 0x1df   : > { %v2173_v36 = vadd.f32 %v2141_v20, %v2109_v45  ;;  %v2111_v60 = vmul.f32 %v1888_v35, %v1888_v35  ;;  %v2143_v4 = vmul.f32 %v2001_v26, %v2001_v26 }
 0x1e0   : > { %v2174_v37 = vadd.f32 %v2142_v34, %v2110_v24 }
 0x1e1   : > { %v2175_v54 = vadd.f32 %v2143_v4, %v2111_v60  ;;  %2330 = vmatprep.mubr.f32.mxu1 %v2173_v36 }
 0x1e2   : > { %2331 = vmatmul.mubr.f32.gmra.mrb[36].mxu1 %v2172_v23 }
 0x1e3   : > { %v1892_v27 = vpop.f32.mrb[24].mxu0  ;;  %v2005_v28 = vpop.f32.mrb[24].mxu1  ;;  %2335 = vmatprep.mubr.f32.mxu1 %v2175_v54 }
 0x1e4   : > { %v2112_v25 = vmul.f32 %v1892_v27, %v1892_v27  ;;  %v2144_v32 = vmul.f32 %v2005_v28, %v2005_v28  ;;  %v1894_v29 = vpop.f32.mrb[25].mxu0  ;;  %v2007_v56 = vpop.f32.mrb[25].mxu1 }
 0x1e5   : > { %v2113_v59 = vmul.f32 %v1894_v29, %v1894_v29  ;;  %v2145_v30 = vmul.f32 %v2007_v56, %v2007_v56  ;;  %v1896_v31 = vpop.f32.mrb[26].mxu0  ;;  %v2009_v33 = vpop.f32.mrb[26].mxu1 }
 0x1e6   : > { %v2176_v39 = vadd.f32 %v2144_v32, %v2112_v25  ;;  %v2114_v40 = vmul.f32 %v1896_v31, %v1896_v31  ;;  %v2146_v12 = vmul.f32 %v2009_v33, %v2009_v33  ;;  %v1898_v41 = vpop.f32.mrb[27].mxu0  ;;  %v2011_v42 = vpop.f32.mrb[27].mxu1  ;;  %2336 = vmatmul.mubr.f32.gmra.mrb[38].mxu1 %v2174_v37 }
 0x1e7   : > { %v2177_v43 = vadd.f32 %v2145_v30, %v2113_v59  ;;  %v2115_v44 = vmul.f32 %v1898_v41, %v1898_v41  ;;  %v2147_v62 = vmul.f32 %v2011_v42, %v2011_v42 }
 0x1e8   : > { %v2178_v6 = vadd.f32 %v2146_v12, %v2114_v40 }
 0x1e9   : > { %v2179_v46 = vadd.f32 %v2147_v62, %v2115_v44  ;;  %2340 = vmatprep.mubr.f32.mxu1 %v2177_v43 }
 0x1ea   : > { %2341 = vmatmul.mubr.f32.gmra.mrb[40].mxu1 %v2176_v39 }
 0x1eb   : > { %v1902_v47 = vpop.f32.mrb[28].mxu0  ;;  %v2015_v48 = vpop.f32.mrb[28].mxu1  ;;  %2345 = vmatprep.mubr.f32.mxu1 %v2179_v46 }
 0x1ec   : > { %v2116_v49 = vmul.f32 %v1902_v47, %v1902_v47  ;;  %v2148_v50 = vmul.f32 %v2015_v48, %v2015_v48  ;;  %v1904_v51 = vpop.f32.mrb[29].mxu0  ;;  %v2017_v52 = vpop.f32.mrb[29].mxu1 }
 0x1ed   : > { %v2117_v53 = vmul.f32 %v1904_v51, %v1904_v51  ;;  %v2149_v55 = vmul.f32 %v2017_v52, %v2017_v52  ;;  %v1906_v57 = vpop.f32.mrb[30].mxu0  ;;  %v2019_v58 = vpop.f32.mrb[30].mxu1 }
 0x1ee   : > { %v2180_v61 = vadd.f32 %v2148_v50, %v2116_v49  ;;  %v2118_v63 = vmul.f32 %v1906_v57, %v1906_v57  ;;  %v2150_v0 = vmul.f32 %v2019_v58, %v2019_v58  ;;  %v1908_v18 = vpop.f32.mrb[31].mxu0  ;;  %v2021_v19 = vpop.f32.mrb[31].mxu1  ;;  %2346 = vmatmul.mubr.f32.gmra.mrb[42].mxu1 %v2178_v6 }
 0x1ef   : > { %v2181_v1 = vadd.f32 %v2149_v55, %v2117_v53  ;;  %v2119_v2 = vmul.f32 %v1908_v18, %v1908_v18  ;;  %v2151_v3 = vmul.f32 %v2021_v19, %v2021_v19 }
 0x1f0   : > { %v2182_v5 = vadd.f32 %v2150_v0, %v2118_v63 }
 0x1f1   : > { %v2183_v7 = vadd.f32 %v2151_v3, %v2119_v2  ;;  %2350 = vmatprep.mubr.f32.mxu1 %v2181_v1 }
 0x1f2   : > { %2351 = vmatmul.mubr.f32.gmra.mrb[44].mxu1 %v2180_v61 }
 0x1f3   : > { %2355 = vmatprep.mubr.f32.mxu1 %v2183_v7 }
 0x1f6   : > { %2356 = vmatmul.mubr.f32.gmra.mrb[46].mxu1 %v2182_v5 }
 0x28d   : > { %v2801_v8 = vpop.f32.mrb[32].mxu0 }
 0x28e   : > { %v2802_v9 = vpop.f32.mrb[33].mxu0 }
 0x28f   : > { %v2803_v10 = vadd.f32 %v2802_v9, %v2801_v8 }
 0x291   : > { %v2283_v11 = vadd.f32 0.001, %v2803_v10  ;;  %v2804_v13 = vpop.f32.mrb[34].mxu0 }
 0x292   : > { %v2805_v14 = vpop.f32.mrb[35].mxu0 }
 0x293   : > { %3300 = vlog2.f32 %v2283_v11  ;;  %v2806_v15 = vadd.f32 %v2805_v14, %v2804_v13 }
 0x295   : > { %v2288_v16 = vadd.f32 0.001, %v2806_v15  ;;  %v2807_v17 = vpop.f32.mrb[36].mxu0 }
 0x296   : > { %v2808_v38 = vpop.f32.mrb[37].mxu0 }
 0x297   : > { %3302 = vlog2.f32 %v2288_v16  ;;  %v2809_v45 = vadd.f32 %v2808_v38, %v2807_v17 }
 0x299   : > { %v2293_v20 = vadd.f32 0.001, %v2809_v45  ;;  %v2810_v21 = vpop.f32.mrb[38].mxu0 }
 0x29a   : > { %v2811_v22 = vpop.f32.mrb[39].mxu0 }
 0x29b   : > { %3304 = vlog2.f32 %v2293_v20  ;;  %v2812_v23 = vadd.f32 %v2811_v22, %v2810_v21 }
 0x29d   : > { %v3301_v24 = vpop.eup %3300  ;;  %v2298_v34 = vadd.f32 0.001, %v2812_v23  ;;  %v2813_v35 = vpop.f32.mrb[40].mxu0 }
 0x29e   : > { %v2814_v26 = vpop.f32.mrb[41].mxu0  ;;  %v2362_v36 = vmul.f32 0.6931472, %v3301_v24 }
 0x29f   : > { %3306 = vlog2.f32 %v2298_v34  ;;  %v2815_v60 = vadd.f32 %v2814_v26, %v2813_v35 }
 0x2a0   : > { %2393 = vxpose.xlu0.b32.start [1/16] %v2362_v36, 128 }
 0x2a1   : > { %v3303_v4 = vpop.eup %3302  ;;  %v2303_v37 = vadd.f32 0.001, %v2815_v60  ;;  %v2816_v54 = vpop.f32.mrb[42].mxu0 }
 0x2a2   : > { %v2817_v27 = vpop.f32.mrb[43].mxu0  ;;  %v2364_v28 = vmul.f32 0.6931472, %v3303_v4 }
 0x2a3   : > { %3308 = vlog2.f32 %v2303_v37  ;;  %v2818_v25 = vadd.f32 %v2817_v27, %v2816_v54 }
 0x2a4   : > { %2394 = vxpose.xlu0.b32.cont [2/16] %v2364_v28, 128 }
 0x2a5   : > { %v3305_v32 = vpop.eup %3304  ;;  %v2308_v29 = vadd.f32 0.001, %v2818_v25  ;;  %v2819_v56 = vpop.f32.mrb[44].mxu0 }
 0x2a6   : > { %v2820_v59 = vpop.f32.mrb[45].mxu0  ;;  %v2366_v30 = vmul.f32 0.6931472, %v3305_v32 }
 0x2a7   : > { %3310 = vlog2.f32 %v2308_v29  ;;  %v2821_v31 = vadd.f32 %v2820_v59, %v2819_v56 }
 0x2a8   : > { %2395 = vxpose.xlu0.b32.cont [3/16] %v2366_v30, 128 }
 0x2a9   : > { %v3307_v33 = vpop.eup %3306  ;;  %v2313_v39 = vadd.f32 0.001, %v2821_v31  ;;  %v2822_v40 = vpop.f32.mrb[46].mxu0 }
 0x2aa   : > { %v2823_v12 = vpop.f32.mrb[47].mxu0  ;;  %v2368_v41 = vmul.f32 0.6931472, %v3307_v33 }
 0x2ab   : > { %3312 = vlog2.f32 %v2313_v39  ;;  %v2824_v42 = vadd.f32 %v2823_v12, %v2822_v40 }
 0x2ac   : > { %2396 = vxpose.xlu0.b32.cont [4/16] %v2368_v41, 128 }
 0x2ad   : > { %v3309_v43 = vpop.eup %3308  ;;  %v2318_v44 = vadd.f32 0.001, %v2824_v42  ;;  %v2825_v62 = vpop.f32.mrb[32].mxu1 }
 0x2ae   : > { %v2826_v6 = vpop.f32.mrb[33].mxu1  ;;  %v2370_v46 = vmul.f32 0.6931472, %v3309_v43 }
 0x2af   : > { %3314 = vlog2.f32 %v2318_v44  ;;  %v2827_v47 = vadd.f32 %v2826_v6, %v2825_v62 }
 0x2b0   : > { %2397 = vxpose.xlu0.b32.cont [5/16] %v2370_v46, 128 }
 0x2b1   : > { %v3311_v48 = vpop.eup %3310  ;;  %v2323_v49 = vadd.f32 0.001, %v2827_v47  ;;  %v2828_v50 = vpop.f32.mrb[34].mxu1 }
 0x2b2   : > { %v2829_v51 = vpop.f32.mrb[35].mxu1  ;;  %v2372_v52 = vmul.f32 0.6931472, %v3311_v48 }
 0x2b3   : > { %3316 = vlog2.f32 %v2323_v49  ;;  %v2830_v53 = vadd.f32 %v2829_v51, %v2828_v50 }
 0x2b4   : > { %2398 = vxpose.xlu0.b32.cont [6/16] %v2372_v52, 128 }
 0x2b5   : > { %v3313_v55 = vpop.eup %3312  ;;  %v2328_v57 = vadd.f32 0.001, %v2830_v53  ;;  %v2831_v58 = vpop.f32.mrb[36].mxu1 }
 0x2b6   : > { %v2832_v61 = vpop.f32.mrb[37].mxu1  ;;  %v2374_v63 = vmul.f32 0.6931472, %v3313_v55 }
 0x2b7   : > { %3318 = vlog2.f32 %v2328_v57  ;;  %v2833_v0 = vadd.f32 %v2832_v61, %v2831_v58 }
 0x2b8   : > { %2399 = vxpose.xlu0.b32.cont [7/16] %v2374_v63, 128 }
 0x2b9   : > { %v3315_v18 = vpop.eup %3314  ;;  %v2333_v19 = vadd.f32 0.001, %v2833_v0  ;;  %v2834_v1 = vpop.f32.mrb[38].mxu1 }
 0x2ba   : > { %v2835_v2 = vpop.f32.mrb[39].mxu1  ;;  %v2376_v3 = vmul.f32 0.6931472, %v3315_v18 }
 0x2bb   : > { %3320 = vlog2.f32 %v2333_v19  ;;  %v2836_v5 = vadd.f32 %v2835_v2, %v2834_v1 }
 0x2bc   : > { %2400 = vxpose.xlu0.b32.cont [8/16] %v2376_v3, 128 }
 0x2bd   : > { %v3317_v7 = vpop.eup %3316  ;;  %v2338_v8 = vadd.f32 0.001, %v2836_v5  ;;  %v2837_v9 = vpop.f32.mrb[40].mxu1 }
 0x2be   : > { %v2838_v10 = vpop.f32.mrb[41].mxu1  ;;  %v2378_v11 = vmul.f32 0.6931472, %v3317_v7 }
 0x2bf   : > { %3322 = vlog2.f32 %v2338_v8  ;;  %v2839_v13 = vadd.f32 %v2838_v10, %v2837_v9 }
 0x2c0   : > { %2401 = vxpose.xlu0.b32.cont [9/16] %v2378_v11, 128 }
 0x2c1   : > { %v3319_v14 = vpop.eup %3318  ;;  %v2343_v15 = vadd.f32 0.001, %v2839_v13  ;;  %v2840_v16 = vpop.f32.mrb[42].mxu1 }
 0x2c2   : > { %v2841_v17 = vpop.f32.mrb[43].mxu1  ;;  %v2380_v38 = vmul.f32 0.6931472, %v3319_v14 }
 0x2c3   : > { %3324 = vlog2.f32 %v2343_v15  ;;  %v2842_v45 = vadd.f32 %v2841_v17, %v2840_v16 }
 0x2c4   : > { %2402 = vxpose.xlu0.b32.cont [10/16] %v2380_v38, 128 }
 0x2c5   : > { %v3321_v20 = vpop.eup %3320  ;;  %v2348_v21 = vadd.f32 0.001, %v2842_v45  ;;  %v2843_v22 = vpop.f32.mrb[44].mxu1 }
 0x2c6   : > { %v2844_v23 = vpop.f32.mrb[45].mxu1  ;;  %v2382_v24 = vmul.f32 0.6931472, %v3321_v20 }
 0x2c7   : > { %3326 = vlog2.f32 %v2348_v21  ;;  %v2845_v34 = vadd.f32 %v2844_v23, %v2843_v22 }
 0x2c8   : > { %2403 = vxpose.xlu0.b32.cont [11/16] %v2382_v24, 128 }
 0x2c9   : > { %v3323_v35 = vpop.eup %3322  ;;  %v2353_v26 = vadd.f32 0.001, %v2845_v34  ;;  %v2846_v36 = vpop.f32.mrb[46].mxu1 }
 0x2ca   : > { %v2847_v60 = vpop.f32.mrb[47].mxu1  ;;  %v2384_v4 = vmul.f32 0.6931472, %v3323_v35 }
 0x2cb   : > { %3328 = vlog2.f32 %v2353_v26  ;;  %v2848_v37 = vadd.f32 %v2847_v60, %v2846_v36 }
 0x2cc   : > { %2404 = vxpose.xlu0.b32.cont [12/16] %v2384_v4, 128 }
 0x2cd   : > { %v3325_v54 = vpop.eup %3324  ;;  %v2358_v27 = vadd.f32 0.001, %v2848_v37 }
 0x2ce   : > { %v2386_v28 = vmul.f32 0.6931472, %v3325_v54 }
 0x2cf   : > { %3330 = vlog2.f32 %v2358_v27 }
 0x2d0   : > { %2405 = vxpose.xlu0.b32.cont [13/16] %v2386_v28, 128 }
 0x2d1   : > { %v3327_v25 = vpop.eup %3326 }
 0x2d2   : > { %v2388_v32 = vmul.f32 0.6931472, %v3327_v25 }
 0x2d4   : > { %2406 = vxpose.xlu0.b32.cont [14/16] %v2388_v32, 128 }
 0x2d5   : > { %v3329_v29 = vpop.eup %3328 }
 0x2d6   : > { %v2390_v56 = vmul.f32 0.6931472, %v3329_v29 }
 0x2d8   : > { %2407 = vxpose.xlu0.b32.cont [15/16] %v2390_v56, 128 }
 0x2d9   : > { %v3331_v59 = vpop.eup %3330 }
 0x2da   : > { %v2392_v30 = vmul.f32 0.6931472, %v3331_v59 }
 0x2dc   : > { %2408 = vxpose.xlu0.b32.end [16/16] %v2392_v30, 128 }
 0x320   : > { %v2409_v31 = vpop.trf.xlu0 }
 0x321   : > { %2425 = vst [vmem:[%s3898_s21] sm:$0xff] %v2409_v31 }
 0x324   : > { %v2410_v33 = vpop.trf.xlu0 }
 0x325   : > { %2426 = vst [vmem:[%s3898_s21 + $0x8] sm:$0xff] %v2410_v33 }
 0x328   : > { %v2411_v39 = vpop.trf.xlu0 }
 0x329   : > { %2427 = vst [vmem:[%s3898_s21 + $0x10] sm:$0xff] %v2411_v39 }
 0x32c   : > { %v2412_v40 = vpop.trf.xlu0 }
 0x32d   : > { %2428 = vst [vmem:[%s3898_s21 + $0x18] sm:$0xff] %v2412_v40 }
 0x330   : > { %v2413_v12 = vpop.trf.xlu0 }
 0x331   : > { %2429 = vst [vmem:[%s3898_s21 + $0x20] sm:$0xff] %v2413_v12 }
 0x334   : > { %v2414_v41 = vpop.trf.xlu0 }
 0x335   : > { %2430 = vst [vmem:[%s3898_s21 + $0x28] sm:$0xff] %v2414_v41 }
 0x338   : > { %v2415_v42 = vpop.trf.xlu0 }
 0x339   : > { %2431 = vst [vmem:[%s3898_s21 + $0x30] sm:$0xff] %v2415_v42 }
 0x33c   : > { %v2416_v43 = vpop.trf.xlu0 }
 0x33d   : > { %2432 = vst [vmem:[%s3898_s21 + $0x38] sm:$0xff] %v2416_v43 }
 0x340   : > { %v2417_v44 = vpop.trf.xlu0 }
 0x341   : > { %2433 = vst [vmem:[%s3898_s21 + $0x40] sm:$0xff] %v2417_v44 }
 0x344   : > { %v2418_v62 = vpop.trf.xlu0 }
 0x345   : > { %2434 = vst [vmem:[%s3898_s21 + $0x48] sm:$0xff] %v2418_v62 }
 0x348   : > { %v2419_v6 = vpop.trf.xlu0 }
 0x349   : > { %2435 = vst [vmem:[%s3898_s21 + $0x50] sm:$0xff] %v2419_v6 }
 0x34c   : > { %v2420_v46 = vpop.trf.xlu0 }
 0x34d   : > { %2436 = vst [vmem:[%s3898_s21 + $0x58] sm:$0xff] %v2420_v46 }
 0x350   : > { %v2421_v47 = vpop.trf.xlu0 }
 0x351   : > { %2437 = vst [vmem:[%s3898_s21 + $0x60] sm:$0xff] %v2421_v47 }
 0x354   : > { %v2422_v48 = vpop.trf.xlu0 }
 0x355   : > { %2438 = vst [vmem:[%s3898_s21 + $0x68] sm:$0xff] %v2422_v48 }
 0x358   : > { %v2423_v49 = vpop.trf.xlu0 }
 0x359   : > { %2439 = vst [vmem:[%s3898_s21 + $0x70] sm:$0xff] %v2423_v49 }
 0x35c   : > { %v2424_v50 = vpop.trf.xlu0 }
 0x35d   : > { %2440 = vst [vmem:[%s3898_s21 + $0x78] sm:$0xff] %v2424_v50 }
 0x35e   : > { %3373 = shalt.err (!%p3370_p6)
}
 0x35f   : > { %s3374_s9 = scalar_lea.hbm %s3920_s29, 2048  ;;  %s3378_s12 = scalar_lea.hbm %s3977_s4, 4096 }
 0x360   : > { %p3375_p7 = scmp.ne.s32.totalorder %s3920_s29, %s3374_s9  ;;  %p3379_p0 = scmp.lt.u32.totalorder %s3920_s29, %s3977_s4 }
 0x361   : > { %p3380_p2 = scmp.lt.u32.totalorder %s3378_s12, %s3374_s9  ;;  %p3382_p8 = scmp.lt.u32.totalorder %s3374_s9, %s3920_s29 }
 0x362   : > { %p3376_p9 = pnand %p3375_p7, %p3989_p10 }
 0x363   : > { %p3381_p4 = por %p3380_p2, %p3379_p0 }
 0x364   : > { %p3377_p12 = pneg %p3376_p9 }
 0x365   : > { %p3383_p11 = por %p3382_p8, %p3381_p4 }
 0x367   : > { %p3384_p13 = pnand %p3383_p11, %p3377_p12 }
 0x369   : > { %3387 = shalt.err (!%p3384_p13)
}
 0x36a   : > { %s3449_s21 = smov 128   ;;  %s3450_s22 = smov 8  }
 0x36b   : > { %3029 = dma.vmem_to_hbm [thread:$0]  (%p3989_p10), %s3922_s24, 2048, %s3920_s29, %s3927_s30, %s3449_s21, %s3449_s21, %s3450_s22  }
 0x36c PF: > { %p3041_p1 = scmp.ge.s32.totalorder %s3442_s20, 2  ;;  %s2471_s26 = sand.u32 1, %s3422_s15  }
 0x36d   : > { %p3990_p3 = scmp.ne.s32.totalorder %s3983_s27, 0  ;;  %s2472_s5 = scalar_lea.sflag [#allocation4], %s2471_s26 }
 0x36f   : > { %p3036_p5 = pnand %p3041_p1, %p3990_p3 }
 0x371   : > { %3417 = dma.done.wait (!%p3036_p5), %s2472_s5, 2048  }
 0x372   : > { %3419 = vsyncadd (!%p3036_p5), %s2472_s5, 4294965248  ;;  %s18_s20 = sadd.s32 1, %s3442_s20   ;;  %s3991_s15 = smov %s3426_s16 }
 0x373   : > { %p15_p6 = scmp.ge.s32.totalorder %s18_s20, 4   ;;  %s3992_s16 = smov %s3430_s17 }
 0x374   : > { %s3993_s17 = smov %s3529_s28  ;;  %s3994_s18 = smov %s3438_s19 }
 0x375   : > { %s3995_s19 = smov %s3997_s23  ;;  %17 = sbr.rel (!%p15_p6) target bundleno = 5 (0x5), region = 79 }
 0x37c   :  { %2477 = vsyncpa [#allocation3], 1 }
 0x37d   :  { %2479 = vsyncpa [#allocation3 + $0x1], 1 }
 0x37e   :  { %2480 = vsyncpa [#allocation4], 1 }
 0x37f   :  { %2482 = vsyncpa [#allocation4 + $0x1], 1 }

</bundles_post_ra>
